<compile_context>
chip_gen: v5e
topology: v5e:2x2
jax: 0.10.0
libtpu: 0.0.40
codegen_flags: <defaults>
</compile_context>

<pallas_src>
import functools

import numpy as np
import jax
import jax.numpy as jnp
from jax.experimental import pallas as pl
from jax.experimental.pallas import tpu as pltpu

# Safe on v5e/v6e (128 MiB phys) and within v7x's 64 MiB; all blocks here are tiny.
_VMEM_LIMIT = 32 * 1024 * 1024


def _round_up(x, m):
    return ((x + m - 1) // m) * m


# ----------------------------------------------------------------------------
# Pallas kernels
# ----------------------------------------------------------------------------
def _feat_kernel(x_ref, w1_ref, b1_ref, w2_ref, b2_ref, p_ref, wm_ref, bm_ref, o_ref):
    """Fused conv1+ReLU -> conv2+ReLU -> adaptive pool -> map2 linear.

    x_ref:  (TILE_R, L)            bf16   rows of the per-node time windows
    w1_ref: (L, L*C1)              bf16   banded conv1 weights
    w2_ref: (L*C1, L*C2)           bf16   banded conv2 weights
    p_ref:  (L*C2, 256)            bf16   adaptive-avg-pool matrix (cols zero-padded 224->256)
    wm_ref: (256, 128)             bf16   nonlin_map2 linear (rows/cols zero-padded)
    biases: (1, ...)               f32
    o_ref:  (TILE_R, 128)          f32    lane-dense (cols 2H..127 are exactly zero)
    """
    x = x_ref[...]
    h1 = jnp.dot(x, w1_ref[...], preferred_element_type=jnp.float32) + b1_ref[...]
    h1 = jnp.maximum(h1, 0.0).astype(jnp.bfloat16)
    h2 = jnp.dot(h1, w2_ref[...], preferred_element_type=jnp.float32) + b2_ref[...]
    h2 = jnp.maximum(h2, 0.0).astype(jnp.bfloat16)
    pooled = jnp.dot(h2, p_ref[...], preferred_element_type=jnp.float32)
    a2 = jnp.dot(pooled.astype(jnp.bfloat16), wm_ref[...],
                 preferred_element_type=jnp.float32) + bm_ref[...]
    o_ref[...] = a2


def pallas_feature_extractor(x_rows, w1b, b1b, w2b, b2b, pool_mat, wm, bm):
    """x_rows: [R, L] -> [R, H2P]; everything after the reshape fused in one kernel."""
    R, L = x_rows.shape
    LC1 = w1b.shape[1]
    LC2 = w2b.shape[1]
    POOLP = pool_mat.shape[1]
    H2P = wm.shape[1]

    # >=2 "parallel" grid steps when possible (v7x megacore), sublane-aligned tiles,
    # capped at 512 rows/tile so the fused intermediates fit v7x's 64 MiB VMEM.
    if R >= 1024:
        tile_r = 512
    else:
        tile_r = max(8, _round_up((R + 1) // 2, 8))
    r_pad = _round_up(R, tile_r)
    if r_pad != R:
        x_rows = jnp.pad(x_rows, ((0, r_pad - R), (0, 0)))

    out = pl.pallas_call(
        _feat_kernel,
        out_shape=jax.ShapeDtypeStruct((r_pad, H2P), jnp.float32),
        grid=(r_pad // tile_r,),
        in_specs=[
            pl.BlockSpec((tile_r, L), lambda i: (i, 0)),
            pl.BlockSpec((L, LC1), lambda i: (0, 0)),
            pl.BlockSpec((1, LC1), lambda i: (0, 0)),
            pl.BlockSpec((LC1, LC2), lambda i: (0, 0)),
            pl.BlockSpec((1, LC2), lambda i: (0, 0)),
            pl.BlockSpec((LC2, POOLP), lambda i: (0, 0)),
            pl.BlockSpec((POOLP, H2P), lambda i: (0, 0)),
            pl.BlockSpec((1, H2P), lambda i: (0, 0)),
        ],
        out_specs=pl.BlockSpec((tile_r, H2P), lambda i: (i, 0)),
        compiler_params=pltpu.CompilerParams(
            dimension_semantics=("parallel",),
            vmem_limit_bytes=_VMEM_LIMIT),
    )(
        x_rows.astype(jnp.bfloat16),
        w1b.astype(jnp.bfloat16), b1b.reshape(1, -1).astype(jnp.float32),
        w2b.astype(jnp.bfloat16), b2b.reshape(1, -1).astype(jnp.float32),
        pool_mat.astype(jnp.bfloat16),
        wm.astype(jnp.bfloat16), bm.reshape(1, -1).astype(jnp.float32),
    )
    return out[:R]


def _mpnn_fc_kernel(x_ref, pe_ref, wm_ref, bm_ref, w1_ref, b1_ref, w2_ref, b2_ref,
                    w3_ref, b3_ref, o_ref):
    """Whole-batch fused: BatchNorm1d + PE + dual-MPNN (shared softmax graph)
    + temporal mean + fc1/fc2/fc3.

    x_ref:  (B, T, N, D)   f32    feature-extractor output (D = 128, lane-padded 2H)
    pe_ref: (B*T, 1, D)    f32    positional encoding per (b, t) row, lane-padded
    wm_ref: (D, D)         bf16   concat([mpnn1_w, mpnn2_w], -1), zero-padded
    w1/w2:  (D, D)         bf16   fc1/fc2, zero-padded
    w3:     (D, SP)        bf16   fc3, cols zero-padded seq_len -> 128
    o_ref:  (B, N, SP)     f32    lane-dense output
    """
    B, T, N, D = x_ref.shape
    H2P = wm_ref.shape[1]
    R = B * T * N

    # --- fused nonlin_map2 BatchNorm1d (train-mode batch statistics over all rows) ---
    xr = x_ref[...].reshape(R, D)
    mu = jnp.mean(xr, axis=0, keepdims=True)
    var = jnp.mean(jnp.square(xr - mu), axis=0, keepdims=True)
    xr = (xr - mu) * jax.lax.rsqrt(var + 1e-5)

    # --- fused positional encoding over the scale_num axis ---
    x3 = xr.reshape(B * T, N, D) + pe_ref[...]           # (B*T, 1, D) broadcast over nodes
    xb = x3.astype(jnp.bfloat16)

    # --- dot-product graph + exact softmax (computed once, shared by both MPNN blocks) ---
    s = jnp.einsum("knd,kmd->knm", xb, xb, preferred_element_type=jnp.float32)
    s = s - jnp.max(s, axis=-1, keepdims=True)
    p = jnp.exp(s)
    a = (p / jnp.sum(p, axis=-1, keepdims=True)).astype(jnp.bfloat16)

    # --- message passing + joint projection (== concat of the two MPNN projections) ---
    ax = jnp.einsum("knm,kmd->knd", a, xb, preferred_element_type=jnp.float32)
    h = jnp.dot(ax.reshape(R, D).astype(jnp.bfloat16), wm_ref[...],
                preferred_element_type=jnp.float32) + bm_ref[...]
    h = jnp.maximum(h, 0.0)                               # (R, H2P)

    # --- temporal mean over scale_num: one reduction, no serial add chain ---
    m = jnp.mean(h.reshape(B, T, N, H2P), axis=1).reshape(B * N, H2P)

    # --- fc stack, activations stay in VMEM ---
    f = jnp.maximum(jnp.dot(m.astype(jnp.bfloat16), w1_ref[...],
                            preferred_element_type=jnp.float32) + b1_ref[...], 0.0)
    f = jnp.maximum(jnp.dot(f.astype(jnp.bfloat16), w2_ref[...],
                            preferred_element_type=jnp.float32) + b2_ref[...], 0.0)
    f = jnp.dot(f.astype(jnp.bfloat16), w3_ref[...],
                preferred_element_type=jnp.float32) + b3_ref[...]
    o_ref[...] = f.reshape(B, N, -1)


def pallas_mpnn_fc(x, pe_rows, w_mpnn, b_mpnn, fc1_w, fc1_b, fc2_w, fc2_b, fc3_w, fc3_b):
    """x: [bs, T, N, D] (lane-padded) -> [bs, N, SP] (lane-padded seq_len)."""
    bs, T, N, D = x.shape
    H2P = w_mpnn.shape[1]
    SP = fc3_w.shape[1]
    return pl.pallas_call(
        _mpnn_fc_kernel,
        out_shape=jax.ShapeDtypeStruct((bs, N, SP), jnp.float32),
        grid=(1,),
        in_specs=[
            pl.BlockSpec((bs, T, N, D), lambda i: (0, 0, 0, 0)),
            pl.BlockSpec((bs * T, 1, D), lambda i: (0, 0, 0)),
            pl.BlockSpec((D, H2P), lambda i: (0, 0)),
            pl.BlockSpec((1, H2P), lambda i: (0, 0)),
            pl.BlockSpec((H2P, H2P), lambda i: (0, 0)),
            pl.BlockSpec((1, H2P), lambda i: (0, 0)),
            pl.BlockSpec((H2P, H2P), lambda i: (0, 0)),
            pl.BlockSpec((1, H2P), lambda i: (0, 0)),
            pl.BlockSpec((H2P, SP), lambda i: (0, 0)),
            pl.BlockSpec((1, SP), lambda i: (0, 0)),
        ],
        out_specs=pl.BlockSpec((bs, N, SP), lambda i: (0, 0, 0)),
        compiler_params=pltpu.CompilerParams(
            dimension_semantics=("arbitrary",),
            vmem_limit_bytes=_VMEM_LIMIT),
    )(
        x.astype(jnp.float32),
        pe_rows.astype(jnp.float32),
        w_mpnn.astype(jnp.bfloat16), b_mpnn.reshape(1, -1).astype(jnp.float32),
        fc1_w.astype(jnp.bfloat16), fc1_b.reshape(1, -1).astype(jnp.float32),
        fc2_w.astype(jnp.bfloat16), fc2_b.reshape(1, -1).astype(jnp.float32),
        fc3_w.astype(jnp.bfloat16), fc3_b.reshape(1, -1).astype(jnp.float32),
    )


# ----------------------------------------------------------------------------
# Host-side constants (cached per shape) & banded conv weights
# ----------------------------------------------------------------------------
@functools.lru_cache(maxsize=None)
def adaptive_pool_matrix_np(L, out=224):
    """Averaging matrix reproducing F.adaptive_avg_pool1d(x, out) over the flattened dim."""
    P = np.zeros((L, out), np.float32)
    for i in range(out):
        s = (i * L) // out
        e = -(-((i + 1) * L) // out)  # ceil
        P[s:e, i] = 1.0 / (e - s)
    return P


@functools.lru_cache(maxsize=None)
def sinusoidal_pe_np(length, d):
    pos = np.arange(length, dtype=np.float32)[:, None]
    div = np.exp(np.arange(0, d, 2, dtype=np.float32) * (-np.log(10000.0) / d))
    pe = np.zeros((length, d), np.float32)
    pe[:, 0::2] = np.sin(pos * div)
    pe[:, 1::2] = np.cos(pos * div)
    return pe


@functools.lru_cache(maxsize=None)
def _conv_band_indices(L, k):
    pad_l = (k - 1) // 2
    ii = np.arange(L)[:, None]
    tt = np.arange(L)[None, :]
    jj = ii - tt + pad_l                     # kernel tap index
    valid = ((jj >= 0) & (jj < k)).astype(np.float32)
    return np.clip(jj, 0, k - 1), valid


def band_conv1(w1, b1, L, k, C1):
    """w1: [k, C1] (Cin=1) -> banded [L, L*C1] same-padded conv matmul."""
    jj, valid = _conv_band_indices(L, k)
    w1b = w1[jj] * jnp.asarray(valid)[..., None]                  # (L, L, C1)
    return w1b.reshape(L, L * C1), jnp.tile(b1, L)


def band_conv2(w2, b2, L, k, C1, C2):
    """w2: [k*C1, C2] -> banded [L*C1, L*C2] same-padded conv matmul."""
    jj, valid = _conv_band_indices(L, k)
    w2r = w2.reshape(k, C1, C2)
    w2b = w2r[jj] * jnp.asarray(valid)[..., None, None]           # (L, L, C1, C2)
    w2b = jnp.transpose(w2b, (0, 2, 1, 3)).reshape(L * C1, L * C2)
    return w2b, jnp.tile(b2, L)


# ----------------------------------------------------------------------------
# FFT-based scale selection (matches PyTorch's CPU round-trip)
# ----------------------------------------------------------------------------
def fft_for_period(x, k=2):
    xf = jnp.fft.rfft(x, axis=1)
    freq = jnp.abs(xf).mean(0).mean(-1)
    freq = freq.at[0].set(0.0)
    _, top = jax.lax.top_k(freq, k)
    top = np.asarray(jax.device_get(top))   # host sync (same as PyTorch .cpu().numpy())
    period = x.shape[1] // top
    weights = jnp.abs(xf).mean(-1)[:, top]
    return period, weights


# ----------------------------------------------------------------------------
# GraphBlock / Model forward
# ----------------------------------------------------------------------------
@jax.jit
def graph_block_forward(p, x):
    """x: [bs, scale_num, scale, num_nodes] -> [bs, seq_len, num_nodes]."""
    bs, scale_num, scale, num_nodes = x.shape
    k = p["conv1_w"].shape[0]          # Cin = 1
    C1 = p["conv1_w"].shape[1]
    C2 = p["conv2_w"].shape[1]
    POOL = p["map2_w"].shape[0]        # 224
    H2 = p["map2_w"].shape[1]          # 2 * hidden_dim
    S = p["fc3_w"].shape[1]            # seq_len
    POOLP = _round_up(POOL, 128)       # 256 (matches 256-wide MXU on v6e/v7x)
    H2P = _round_up(H2, 128)           # lane-dense feature width
    SP = _round_up(S, 128)             # lane-dense output width
    R = bs * scale_num * num_nodes

    # --- fused feature extractor (conv1+conv2+pool+map2), lane-dense output --
    x_rows = x.reshape(R, scale)       # same raw reshape as torch.reshape in the module
    w1b, b1b = band_conv1(p["conv1_w"], p["conv1_b"], scale, k, C1)
    w2b, b2b = band_conv2(p["conv2_w"], p["conv2_b"], scale, k, C1, C2)
    pool_mat = jnp.pad(jnp.asarray(adaptive_pool_matrix_np(scale * C2, POOL)),
                       ((0, 0), (0, POOLP - POOL)))
    map2_w = jnp.pad(p["map2_w"], ((0, POOLP - POOL), (0, H2P - H2)))
    map2_b = jnp.pad(p["map2_b"], (0, H2P - H2))
    a2 = pallas_feature_extractor(x_rows, w1b, b1b, w2b, b2b, pool_mat,
                                  map2_w, map2_b)                 # [R, H2P]

    # --- fused BN + PE + dual-MPNN + temporal mean + fc stack (whole batch) ---
    x4 = a2.reshape(bs, scale_num, num_nodes, H2P)
    pe = jnp.pad(jnp.asarray(sinusoidal_pe_np(scale_num, H2)),
                 ((0, 0), (0, H2P - H2)))
    pe_rows = jnp.tile(pe[:, None, :], (bs, 1, 1))                # (bs*T, 1, H2P)

    w_mpnn = jnp.pad(jnp.concatenate([p["mpnn1_w"], p["mpnn2_w"]], axis=1),
                     ((0, H2P - H2), (0, H2P - H2)))
    b_mpnn = jnp.pad(jnp.concatenate([p["mpnn1_b"], p["mpnn2_b"]], axis=0),
                     (0, H2P - H2))
    fc1_w = jnp.pad(p["fc1_w"], ((0, H2P - H2), (0, H2P - H2)))
    fc1_b = jnp.pad(p["fc1_b"], (0, H2P - H2))
    fc2_w = jnp.pad(p["fc2_w"], ((0, H2P - H2), (0, H2P - H2)))
    fc2_b = jnp.pad(p["fc2_b"], (0, H2P - H2))
    fc3_w = jnp.pad(p["fc3_w"], ((0, H2P - H2), (0, SP - S)))
    fc3_b = jnp.pad(p["fc3_b"], (0, SP - S))

    f = pallas_mpnn_fc(x4, pe_rows, w_mpnn, b_mpnn,
                       fc1_w, fc1_b, fc2_w, fc2_b, fc3_w, fc3_b)  # [bs, N, SP]
    f = f[:, :, :S]                                               # drop lane padding
    return jnp.transpose(f, (0, 2, 1))                            # [bs, seq_len, N]


def model_forward(params_list, cfg, x_enc, x_mark_enc=None, x_dec=None,
                  x_mark_dec=None, mask=None):
    bs, seq_len, num_nodes = x_enc.shape
    k = cfg["top_k"]
    scale_list, _scale_weight = fft_for_period(x_enc, k)
    outputs = []
    for i in range(k - 1):
        scale = int(scale_list[i + 1])
        if seq_len % scale != 0:
            length = (seq_len // scale + 1) * scale
            padding = jnp.zeros((bs, length - seq_len, num_nodes), x_enc.dtype)
            out = jnp.concatenate([x_enc, padding], axis=1)
        else:
            length = seq_len
            out = x_enc
        scale_num = length // scale
        out = out.reshape(bs, scale_num, scale, num_nodes)
        outputs.append(graph_block_forward(params_list[i], out))
    return outputs


# ----------------------------------------------------------------------------
# Deterministic parameter initialization
# ----------------------------------------------------------------------------
def init_graph_block_params(key, cfg):
    k = cfg["conv_kernel"]
    C1 = cfg["lstmhidden_dim"]
    C2 = cfg["lstmout_dim"]
    H = cfg["hidden_dim"]
    H2 = 2 * H
    seq_len = cfg["seq_len"]
    keys = jax.random.split(key, 16)

    def u(kk, shape, fan_in):
        return jax.random.uniform(kk, shape, jnp.float32, -1.0, 1.0) / np.sqrt(fan_in)

    return dict(
        conv1_w=u(keys[0], (k * 1, C1), k),
        conv1_b=u(keys[1], (C1,), k),
        conv2_w=u(keys[2], (k * C1, C2), k * C1),
        conv2_b=u(keys[3], (C2,), k * C1),
        map2_w=u(keys[4], (224, H2), 224),
        map2_b=u(keys[5], (H2,), 224),
        mpnn1_w=u(keys[6], (H2, H), H2),
        mpnn1_b=u(keys[7], (H,), H2),
        mpnn2_w=u(keys[8], (H2, H), H2),
        mpnn2_b=u(keys[9], (H,), H2),
        fc1_w=u(keys[10], (H2, H2), H2),
        fc1_b=u(keys[11], (H2,), H2),
        fc2_w=u(keys[12], (H2, H2), H2),
        fc2_b=u(keys[13], (H2,), H2),
        fc3_w=u(keys[14], (H2, seq_len), H2),
        fc3_b=u(keys[15], (seq_len,), H2),
    )


# ----------------------------------------------------------------------------
if __name__ == "__main__":
    cfg = dict(
        num_nodes=4,
        seq_len=16,
        pred_len=16,
        top_k=3,
        d_model=16,
        hidden_dim=16,
        lstmhidden_dim=8,
        lstmout_dim=16,
        conv_out=14,       # lstmout_dim * conv_out == 224 (matches nonlin_map2 in_features)
        conv_kernel=3,
    )

    key = jax.random.PRNGKey(0)
    kx, kp = jax.random.split(key)
    bs = 2
    x_enc = jax.random.normal(kx, (bs, cfg["seq_len"], cfg["num_nodes"]), jnp.float32)
    x_mark_enc = x_dec = x_mark_dec = None  # unused by the forward pass

    block_keys = jax.random.split(kp, cfg["top_k"] - 1)
    params_list = [init_graph_block_params(bk, cfg) for bk in block_keys]

    outputs = model_forward(params_list, cfg, x_enc, x_mark_enc, x_dec, x_mark_dec)
    outputs = [jax.block_until_ready(o) for o in outputs]

    for o in outputs:
        assert o.shape == (bs, cfg["seq_len"], cfg["num_nodes"])
        assert bool(jnp.all(jnp.isfinite(o)))

    print("KERNEL_OK")
</pallas_src>

<mosaic_0001>
module attributes {stable_mosaic.version = 11 : i64} {
  func.func @_feat_kernel(%arg0: i32, %arg1: memref<32x2xbf16, #tpu.memory_space<vmem>>, %arg2: memref<2x16xbf16, #tpu.memory_space<vmem>>, %arg3: memref<1x16xf32, #tpu.memory_space<vmem>>, %arg4: memref<16x32xbf16, #tpu.memory_space<vmem>>, %arg5: memref<1x32xf32, #tpu.memory_space<vmem>>, %arg6: memref<32x256xbf16, #tpu.memory_space<vmem>>, %arg7: memref<256x128xbf16, #tpu.memory_space<vmem>>, %arg8: memref<1x128xf32, #tpu.memory_space<vmem>>, %arg9: memref<32x128xf32, #tpu.memory_space<vmem>>) attributes {dimension_semantics = [#tpu.dimension_semantics<parallel>], iteration_bounds = array<i64: 2>, scalar_prefetch = 0 : i64, scratch_operands = 0 : i64, tpu.core_type = #tpu.core_type<tc>, window_params = [{transform_indices = @transform_0, window_bounds = array<i64: 32, 2>}, {pipeline_mode = #tpu.pipeline_mode<synchronous>, transform_indices = @transform_1, window_bounds = array<i64: 2, 16>}, {pipeline_mode = #tpu.pipeline_mode<synchronous>, transform_indices = @transform_2, window_bounds = array<i64: 1, 16>}, {pipeline_mode = #tpu.pipeline_mode<synchronous>, transform_indices = @transform_3, window_bounds = array<i64: 16, 32>}, {pipeline_mode = #tpu.pipeline_mode<synchronous>, transform_indices = @transform_4, window_bounds = array<i64: 1, 32>}, {pipeline_mode = #tpu.pipeline_mode<synchronous>, transform_indices = @transform_5, window_bounds = array<i64: 32, 256>}, {pipeline_mode = #tpu.pipeline_mode<synchronous>, transform_indices = @transform_6, window_bounds = array<i64: 256, 128>}, {pipeline_mode = #tpu.pipeline_mode<synchronous>, transform_indices = @transform_7, window_bounds = array<i64: 1, 128>}, {transform_indices = @transform_8, window_bounds = array<i64: 32, 128>}]} {
    %c0 = arith.constant 0 : index
    %c0_0 = arith.constant 0 : index
    %0 = vector.load %arg1[%c0, %c0_0] : memref<32x2xbf16, #tpu.memory_space<vmem>>, vector<32x2xbf16>
    %c0_1 = arith.constant 0 : index
    %c0_2 = arith.constant 0 : index
    %1 = vector.load %arg2[%c0_1, %c0_2] : memref<2x16xbf16, #tpu.memory_space<vmem>>, vector<2x16xbf16>
    %cst = arith.constant dense<0.000000e+00> : vector<32x16xf32>
    %2 = tpu.matmul %0, %1, %cst {dimension_numbers = #tpu.dot_dimension_numbers<[1], [0], [0], [1], [0, 0, 1, 1], [], []>} : vector<32x2xbf16>, vector<2x16xbf16>, vector<32x16xf32> -> vector<32x16xf32>
    %c0_3 = arith.constant 0 : index
    %c0_4 = arith.constant 0 : index
    %3 = vector.load %arg3[%c0_3, %c0_4] : memref<1x16xf32, #tpu.memory_space<vmem>>, vector<1x16xf32>
    %4 = vector.broadcast %3 : vector<1x16xf32> to vector<32x16xf32>
    %5 = arith.addf %2, %4 : vector<32x16xf32>
    %cst_5 = arith.constant 0.000000e+00 : f32
    %6 = vector.broadcast %cst_5 : f32 to vector<32x16xf32>
    %7 = arith.maximumf %5, %6 : vector<32x16xf32>
    %8 = arith.truncf %7 : vector<32x16xf32> to vector<32x16xbf16>
    %c0_6 = arith.constant 0 : index
    %c0_7 = arith.constant 0 : index
    %9 = vector.load %arg4[%c0_6, %c0_7] : memref<16x32xbf16, #tpu.memory_space<vmem>>, vector<16x32xbf16>
    %cst_8 = arith.constant dense<0.000000e+00> : vector<32x32xf32>
    %10 = tpu.matmul %8, %9, %cst_8 {dimension_numbers = #tpu.dot_dimension_numbers<[1], [0], [0], [1], [0, 0, 1, 1], [], []>} : vector<32x16xbf16>, vector<16x32xbf16>, vector<32x32xf32> -> vector<32x32xf32>
    %c0_9 = arith.constant 0 : index
    %c0_10 = arith.constant 0 : index
    %11 = vector.load %arg5[%c0_9, %c0_10] : memref<1x32xf32, #tpu.memory_space<vmem>>, vector<1x32xf32>
    %12 = vector.broadcast %11 : vector<1x32xf32> to vector<32x32xf32>
    %13 = arith.addf %10, %12 : vector<32x32xf32>
    %cst_11 = arith.constant 0.000000e+00 : f32
    %14 = vector.broadcast %cst_11 : f32 to vector<32x32xf32>
    %15 = arith.maximumf %13, %14 : vector<32x32xf32>
    %16 = arith.truncf %15 : vector<32x32xf32> to vector<32x32xbf16>
    %c0_12 = arith.constant 0 : index
    %c0_13 = arith.constant 0 : index
    %17 = vector.load %arg6[%c0_12, %c0_13] : memref<32x256xbf16, #tpu.memory_space<vmem>>, vector<32x256xbf16>
    %cst_14 = arith.constant dense<0.000000e+00> : vector<32x256xf32>
    %18 = tpu.matmul %16, %17, %cst_14 {dimension_numbers = #tpu.dot_dimension_numbers<[1], [0], [0], [1], [0, 0, 1, 1], [], []>} : vector<32x32xbf16>, vector<32x256xbf16>, vector<32x256xf32> -> vector<32x256xf32>
    %19 = arith.truncf %18 : vector<32x256xf32> to vector<32x256xbf16>
    %c0_15 = arith.constant 0 : index
    %c0_16 = arith.constant 0 : index
    %20 = vector.load %arg7[%c0_15, %c0_16] : memref<256x128xbf16, #tpu.memory_space<vmem>>, vector<256x128xbf16>
    %cst_17 = arith.constant dense<0.000000e+00> : vector<32x128xf32>
    %21 = tpu.matmul %19, %20, %cst_17 {dimension_numbers = #tpu.dot_dimension_numbers<[1], [0], [0], [1], [0, 0, 1, 1], [], []>} : vector<32x256xbf16>, vector<256x128xbf16>, vector<32x128xf32> -> vector<32x128xf32>
    %c0_18 = arith.constant 0 : index
    %c0_19 = arith.constant 0 : index
    %22 = vector.load %arg8[%c0_18, %c0_19] : memref<1x128xf32, #tpu.memory_space<vmem>>, vector<1x128xf32>
    %23 = vector.broadcast %22 : vector<1x128xf32> to vector<32x128xf32>
    %24 = arith.addf %21, %23 : vector<32x128xf32>
    %c0_20 = arith.constant 0 : index
    %c0_21 = arith.constant 0 : index
    %25 = vector.load %arg9[%c0_20, %c0_21] : memref<32x128xf32, #tpu.memory_space<vmem>>, vector<32x128xf32>
    tpu.vector_store %arg9[%c0_20, %c0_21], %24 {strides = array<i32>} : memref<32x128xf32, #tpu.memory_space<vmem>>, vector<32x128xf32>,
    return
  }
  func.func @transform_0(%arg0: i32) -> (i32, i32) {
    %c0_i32 = arith.constant 0 : i32
    %c0_i32_0 = arith.constant 0 : i32
    return %arg0, %c0_i32 : i32, i32
  }
  func.func @transform_1(%arg0: i32) -> (i32, i32) {
    %c0_i32 = arith.constant 0 : i32
    %c0_i32_0 = arith.constant 0 : i32
    %c0_i32_1 = arith.constant 0 : i32
    return %c0_i32, %c0_i32_0 : i32, i32
  }
  func.func @transform_2(%arg0: i32) -> (i32, i32) {
    %c0_i32 = arith.constant 0 : i32
    %c0_i32_0 = arith.constant 0 : i32
    %c0_i32_1 = arith.constant 0 : i32
    return %c0_i32, %c0_i32_0 : i32, i32
  }
  func.func @transform_3(%arg0: i32) -> (i32, i32) {
    %c0_i32 = arith.constant 0 : i32
    %c0_i32_0 = arith.constant 0 : i32
    %c0_i32_1 = arith.constant 0 : i32
    return %c0_i32, %c0_i32_0 : i32, i32
  }
  func.func @transform_4(%arg0: i32) -> (i32, i32) {
    %c0_i32 = arith.constant 0 : i32
    %c0_i32_0 = arith.constant 0 : i32
    %c0_i32_1 = arith.constant 0 : i32
    return %c0_i32, %c0_i32_0 : i32, i32
  }
  func.func @transform_5(%arg0: i32) -> (i32, i32) {
    %c0_i32 = arith.constant 0 : i32
    %c0_i32_0 = arith.constant 0 : i32
    %c0_i32_1 = arith.constant 0 : i32
    return %c0_i32, %c0_i32_0 : i32, i32
  }
  func.func @transform_6(%arg0: i32) -> (i32, i32) {
    %c0_i32 = arith.constant 0 : i32
    %c0_i32_0 = arith.constant 0 : i32
    %c0_i32_1 = arith.constant 0 : i32
    return %c0_i32, %c0_i32_0 : i32, i32
  }
  func.func @transform_7(%arg0: i32) -> (i32, i32) {
    %c0_i32 = arith.constant 0 : i32
    %c0_i32_0 = arith.constant 0 : i32
    %c0_i32_1 = arith.constant 0 : i32
    return %c0_i32, %c0_i32_0 : i32, i32
  }
  func.func @transform_8(%arg0: i32) -> (i32, i32) {
    %c0_i32 = arith.constant 0 : i32
    %c0_i32_0 = arith.constant 0 : i32
    return %arg0, %c0_i32 : i32, i32
  }
}

module attributes {stable_mosaic.version = 11 : i64} {
  func.func @_mpnn_fc_kernel(%arg0: i32, %arg1: memref<2x8x4x128xf32, #tpu.memory_space<vmem>>, %arg2: memref<16x1x128xf32, #tpu.memory_space<vmem>>, %arg3: memref<128x128xbf16, #tpu.memory_space<vmem>>, %arg4: memref<1x128xf32, #tpu.memory_space<vmem>>, %arg5: memref<128x128xbf16, #tpu.memory_space<vmem>>, %arg6: memref<1x128xf32, #tpu.memory_space<vmem>>, %arg7: memref<128x128xbf16, #tpu.memory_space<vmem>>, %arg8: memref<1x128xf32, #tpu.memory_space<vmem>>, %arg9: memref<128x128xbf16, #tpu.memory_space<vmem>>, %arg10: memref<1x128xf32, #tpu.memory_space<vmem>>, %arg11: memref<2x4x128xf32, #tpu.memory_space<vmem>>) attributes {dimension_semantics = [#tpu.dimension_semantics<arbitrary>], iteration_bounds = array<i64: 1>, scalar_prefetch = 0 : i64, scratch_operands = 0 : i64, tpu.core_type = #tpu.core_type<tc>, window_params = [{pipeline_mode = #tpu.pipeline_mode<synchronous>, transform_indices = @transform_0, window_bounds = array<i64: 2, 8, 4, 128>}, {pipeline_mode = #tpu.pipeline_mode<synchronous>, transform_indices = @transform_1, window_bounds = array<i64: 16, 1, 128>}, {pipeline_mode = #tpu.pipeline_mode<synchronous>, transform_indices = @transform_2, window_bounds = array<i64: 128, 128>}, {pipeline_mode = #tpu.pipeline_mode<synchronous>, transform_indices = @transform_3, window_bounds = array<i64: 1, 128>}, {pipeline_mode = #tpu.pipeline_mode<synchronous>, transform_indices = @transform_4, window_bounds = array<i64: 128, 128>}, {pipeline_mode = #tpu.pipeline_mode<synchronous>, transform_indices = @transform_5, window_bounds = array<i64: 1, 128>}, {pipeline_mode = #tpu.pipeline_mode<synchronous>, transform_indices = @transform_6, window_bounds = array<i64: 128, 128>}, {pipeline_mode = #tpu.pipeline_mode<synchronous>, transform_indices = @transform_7, window_bounds = array<i64: 1, 128>}, {pipeline_mode = #tpu.pipeline_mode<synchronous>, transform_indices = @transform_8, window_bounds = array<i64: 128, 128>}, {pipeline_mode = #tpu.pipeline_mode<synchronous>, transform_indices = @transform_9, window_bounds = array<i64: 1, 128>}, {pipeline_mode = #tpu.pipeline_mode<synchronous>, transform_indices = @transform_10, window_bounds = array<i64: 2, 4, 128>}]} {
    %c0 = arith.constant 0 : index
    %c0_0 = arith.constant 0 : index
    %c0_1 = arith.constant 0 : index
    %c0_2 = arith.constant 0 : index
    %0 = vector.load %arg1[%c0, %c0_0, %c0_1, %c0_2] : memref<2x8x4x128xf32, #tpu.memory_space<vmem>>, vector<2x8x4x128xf32>
    %1 = vector.shape_cast %0 : vector<2x8x4x128xf32> to vector<64x128xf32>
    %cst = arith.constant dense<0.000000e+00> : vector<128xf32>
    %2 = vector.multi_reduction <add>, %1, %cst [0] : vector<64x128xf32> to vector<128xf32>
    %3 = vector.shape_cast %2 : vector<128xf32> to vector<1x128xf32>
    %cst_3 = arith.constant 6.400000e+01 : f32
    %4 = vector.broadcast %cst_3 : f32 to vector<1x128xf32>
    %5 = arith.divf %3, %4 : vector<1x128xf32>
    %6 = vector.broadcast %5 : vector<1x128xf32> to vector<64x128xf32>
    %7 = arith.subf %1, %6 : vector<64x128xf32>
    %8 = arith.mulf %7, %7 : vector<64x128xf32>
    %cst_4 = arith.constant dense<0.000000e+00> : vector<128xf32>
    %9 = vector.multi_reduction <add>, %8, %cst_4 [0] : vector<64x128xf32> to vector<128xf32>
    %10 = vector.shape_cast %9 : vector<128xf32> to vector<1x128xf32>
    %cst_5 = arith.constant 6.400000e+01 : f32
    %11 = vector.broadcast %cst_5 : f32 to vector<1x128xf32>
    %12 = arith.divf %10, %11 : vector<1x128xf32>
    %13 = vector.broadcast %5 : vector<1x128xf32> to vector<64x128xf32>
    %14 = arith.subf %1, %13 : vector<64x128xf32>
    %cst_6 = arith.constant 9.99999974E-6 : f32
    %15 = vector.broadcast %cst_6 : f32 to vector<1x128xf32>
    %16 = arith.addf %12, %15 : vector<1x128xf32>
    %17 = math.rsqrt %16 : vector<1x128xf32>
    %18 = vector.broadcast %17 : vector<1x128xf32> to vector<64x128xf32>
    %19 = arith.mulf %14, %18 : vector<64x128xf32>
    %20 = vector.shape_cast %19 : vector<64x128xf32> to vector<16x4x128xf32>
    %c0_7 = arith.constant 0 : index
    %c0_8 = arith.constant 0 : index
    %c0_9 = arith.constant 0 : index
    %21 = vector.load %arg2[%c0_7, %c0_8, %c0_9] : memref<16x1x128xf32, #tpu.memory_space<vmem>>, vector<16x1x128xf32>
    %22 = vector.broadcast %21 : vector<16x1x128xf32> to vector<16x4x128xf32>
    %23 = arith.addf %20, %22 : vector<16x4x128xf32>
    %24 = arith.truncf %23 : vector<16x4x128xf32> to vector<16x4x128xbf16>
    "tpu.trace_start"() <{level = 10 : i32, message = "knd,kmd->knm"}> : () -> ()
    %cst_10 = arith.constant dense<0.000000e+00> : vector<16x4x4xf32>
    %25 = tpu.matmul %24, %24, %cst_10 {dimension_numbers = #tpu.dot_dimension_numbers<[2], [2], [1], [1], [0, 0, 0, 1, 1, 1], [0], [0]>} : vector<16x4x128xbf16>, vector<16x4x128xbf16>, vector<16x4x4xf32> -> vector<16x4x4xf32>
    "tpu.trace_stop"() : () -> ()
    %cst_11 = arith.constant dense<0xFF800000> : vector<16x4xf32>
    %26 = vector.multi_reduction <maximumf>, %25, %cst_11 [2] : vector<16x4x4xf32> to vector<16x4xf32>
    %27 = vector.shape_cast %26 : vector<16x4xf32> to vector<16x4x1xf32>
    %28 = vector.broadcast %27 : vector<16x4x1xf32> to vector<16x4x4xf32>
    %29 = arith.subf %25, %28 : vector<16x4x4xf32>
    %30 = math.exp %29 : vector<16x4x4xf32>
    %cst_12 = arith.constant dense<0.000000e+00> : vector<16x4xf32>
    %31 = vector.multi_reduction <add>, %30, %cst_12 [2] : vector<16x4x4xf32> to vector<16x4xf32>
    %32 = vector.shape_cast %31 : vector<16x4xf32> to vector<16x4x1xf32>
    %33 = vector.broadcast %32 : vector<16x4x1xf32> to vector<16x4x4xf32>
    %34 = arith.divf %30, %33 : vector<16x4x4xf32>
    %35 = arith.truncf %34 : vector<16x4x4xf32> to vector<16x4x4xbf16>
    "tpu.trace_start"() <{level = 10 : i32, message = "knm,kmd->knd"}> : () -> ()
    %cst_13 = arith.constant dense<0.000000e+00> : vector<16x4x128xf32>
    %36 = tpu.matmul %35, %24, %cst_13 {dimension_numbers = #tpu.dot_dimension_numbers<[2], [1], [1], [2], [0, 0, 0, 1, 1, 2], [0], [0]>} : vector<16x4x4xbf16>, vector<16x4x128xbf16>, vector<16x4x128xf32> -> vector<16x4x128xf32>
    "tpu.trace_stop"() : () -> ()
    %37 = vector.shape_cast %36 : vector<16x4x128xf32> to vector<64x128xf32>
    %38 = arith.truncf %37 : vector<64x128xf32> to vector<64x128xbf16>
    %c0_14 = arith.constant 0 : index
    %c0_15 = arith.constant 0 : index
    %39 = vector.load %arg3[%c0_14, %c0_15] : memref<128x128xbf16, #tpu.memory_space<vmem>>, vector<128x128xbf16>
    %cst_16 = arith.constant dense<0.000000e+00> : vector<64x128xf32>
    %40 = tpu.matmul %38, %39, %cst_16 {dimension_numbers = #tpu.dot_dimension_numbers<[1], [0], [0], [1], [0, 0, 1, 1], [], []>} : vector<64x128xbf16>, vector<128x128xbf16>, vector<64x128xf32> -> vector<64x128xf32>
    %c0_17 = arith.constant 0 : index
    %c0_18 = arith.constant 0 : index
    %41 = vector.load %arg4[%c0_17, %c0_18] : memref<1x128xf32, #tpu.memory_space<vmem>>, vector<1x128xf32>
    %42 = vector.broadcast %41 : vector<1x128xf32> to vector<64x128xf32>
    %43 = arith.addf %40, %42 : vector<64x128xf32>
    %cst_19 = arith.constant 0.000000e+00 : f32
    %44 = vector.broadcast %cst_19 : f32 to vector<64x128xf32>
    %45 = arith.maximumf %43, %44 : vector<64x128xf32>
    %46 = vector.shape_cast %45 : vector<64x128xf32> to vector<2x8x4x128xf32>
    %cst_20 = arith.constant dense<0.000000e+00> : vector<2x4x128xf32>
    %47 = vector.multi_reduction <add>, %46, %cst_20 [1] : vector<2x8x4x128xf32> to vector<2x4x128xf32>
    %cst_21 = arith.constant 8.000000e+00 : f32
    %48 = vector.broadcast %cst_21 : f32 to vector<2x4x128xf32>
    %49 = arith.divf %47, %48 : vector<2x4x128xf32>
    %50 = vector.shape_cast %49 : vector<2x4x128xf32> to vector<8x128xf32>
    %51 = arith.truncf %50 : vector<8x128xf32> to vector<8x128xbf16>
    %c0_22 = arith.constant 0 : index
    %c0_23 = arith.constant 0 : index
    %52 = vector.load %arg5[%c0_22, %c0_23] : memref<128x128xbf16, #tpu.memory_space<vmem>>, vector<128x128xbf16>
    %cst_24 = arith.constant dense<0.000000e+00> : vector<8x128xf32>
    %53 = tpu.matmul %51, %52, %cst_24 {dimension_numbers = #tpu.dot_dimension_numbers<[1], [0], [0], [1], [0, 0, 1, 1], [], []>} : vector<8x128xbf16>, vector<128x128xbf16>, vector<8x128xf32> -> vector<8x128xf32>
    %c0_25 = arith.constant 0 : index
    %c0_26 = arith.constant 0 : index
    %54 = vector.load %arg6[%c0_25, %c0_26] : memref<1x128xf32, #tpu.memory_space<vmem>>, vector<1x128xf32>
    %55 = vector.broadcast %54 : vector<1x128xf32> to vector<8x128xf32>
    %56 = arith.addf %53, %55 : vector<8x128xf32>
    %cst_27 = arith.constant 0.000000e+00 : f32
    %57 = vector.broadcast %cst_27 : f32 to vector<8x128xf32>
    %58 = arith.maximumf %56, %57 : vector<8x128xf32>
    %59 = arith.truncf %58 : vector<8x128xf32> to vector<8x128xbf16>
    %c0_28 = arith.constant 0 : index
    %c0_29 = arith.constant 0 : index
    %60 = vector.load %arg7[%c0_28, %c0_29] : memref<128x128xbf16, #tpu.memory_space<vmem>>, vector<128x128xbf16>
    %cst_30 = arith.constant dense<0.000000e+00> : vector<8x128xf32>
    %61 = tpu.matmul %59, %60, %cst_30 {dimension_numbers = #tpu.dot_dimension_numbers<[1], [0], [0], [1], [0, 0, 1, 1], [], []>} : vector<8x128xbf16>, vector<128x128xbf16>, vector<8x128xf32> -> vector<8x128xf32>
    %c0_31 = arith.constant 0 : index
    %c0_32 = arith.constant 0 : index
    %62 = vector.load %arg8[%c0_31, %c0_32] : memref<1x128xf32, #tpu.memory_space<vmem>>, vector<1x128xf32>
    %63 = vector.broadcast %62 : vector<1x128xf32> to vector<8x128xf32>
    %64 = arith.addf %61, %63 : vector<8x128xf32>
    %cst_33 = arith.constant 0.000000e+00 : f32
    %65 = vector.broadcast %cst_33 : f32 to vector<8x128xf32>
    %66 = arith.maximumf %64, %65 : vector<8x128xf32>
    %67 = arith.truncf %66 : vector<8x128xf32> to vector<8x128xbf16>
    %c0_34 = arith.constant 0 : index
    %c0_35 = arith.constant 0 : index
    %68 = vector.load %arg9[%c0_34, %c0_35] : memref<128x128xbf16, #tpu.memory_space<vmem>>, vector<128x128xbf16>
    %cst_36 = arith.constant dense<0.000000e+00> : vector<8x128xf32>
    %69 = tpu.matmul %67, %68, %cst_36 {dimension_numbers = #tpu.dot_dimension_numbers<[1], [0], [0], [1], [0, 0, 1, 1], [], []>} : vector<8x128xbf16>, vector<128x128xbf16>, vector<8x128xf32> -> vector<8x128xf32>
    %c0_37 = arith.constant 0 : index
    %c0_38 = arith.constant 0 : index
    %70 = vector.load %arg10[%c0_37, %c0_38] : memref<1x128xf32, #tpu.memory_space<vmem>>, vector<1x128xf32>
    %71 = vector.broadcast %70 : vector<1x128xf32> to vector<8x128xf32>
    %72 = arith.addf %69, %71 : vector<8x128xf32>
    %73 = vector.shape_cast %72 : vector<8x128xf32> to vector<2x4x128xf32>
    %c0_39 = arith.constant 0 : index
    %c0_40 = arith.constant 0 : index
    %c0_41 = arith.constant 0 : index
    %74 = vector.load %arg11[%c0_39, %c0_40, %c0_41] : memref<2x4x128xf32, #tpu.memory_space<vmem>>, vector<2x4x128xf32>
    tpu.vector_store %arg11[%c0_39, %c0_40, %c0_41], %73 {strides = array<i32>} : memref<2x4x128xf32, #tpu.memory_space<vmem>>, vector<2x4x128xf32>,
    return
  }
  func.func @transform_0(%arg0: i32) -> (i32, i32, i32, i32) {
    %c0_i32 = arith.constant 0 : i32
    %c0_i32_0 = arith.constant 0 : i32
    %c0_i32_1 = arith.constant 0 : i32
    %c0_i32_2 = arith.constant 0 : i32
    %c0_i32_3 = arith.constant 0 : i32
    return %c0_i32, %c0_i32_0, %c0_i32_1, %c0_i32_2 : i32, i32, i32, i32
  }
  func.func @transform_1(%arg0: i32) -> (i32, i32, i32) {
    %c0_i32 = arith.constant 0 : i32
    %c0_i32_0 = arith.constant 0 : i32
    %c0_i32_1 = arith.constant 0 : i32
    %c0_i32_2 = arith.constant 0 : i32
    return %c0_i32, %c0_i32_0, %c0_i32_1 : i32, i32, i32
  }
  func.func @transform_2(%arg0: i32) -> (i32, i32) {
    %c0_i32 = arith.constant 0 : i32
    %c0_i32_0 = arith.constant 0 : i32
    %c0_i32_1 = arith.constant 0 : i32
    return %c0_i32, %c0_i32_0 : i32, i32
  }
  func.func @transform_3(%arg0: i32) -> (i32, i32) {
    %c0_i32 = arith.constant 0 : i32
    %c0_i32_0 = arith.constant 0 : i32
    %c0_i32_1 = arith.constant 0 : i32
    return %c0_i32, %c0_i32_0 : i32, i32
  }
  func.func @transform_4(%arg0: i32) -> (i32, i32) {
    %c0_i32 = arith.constant 0 : i32
    %c0_i32_0 = arith.constant 0 : i32
    %c0_i32_1 = arith.constant 0 : i32
    return %c0_i32, %c0_i32_0 : i32, i32
  }
  func.func @transform_5(%arg0: i32) -> (i32, i32) {
    %c0_i32 = arith.constant 0 : i32
    %c0_i32_0 = arith.constant 0 : i32
    %c0_i32_1 = arith.constant 0 : i32
    return %c0_i32, %c0_i32_0 : i32, i32
  }
  func.func @transform_6(%arg0: i32) -> (i32, i32) {
    %c0_i32 = arith.constant 0 : i32
    %c0_i32_0 = arith.constant 0 : i32
    %c0_i32_1 = arith.constant 0 : i32
    return %c0_i32, %c0_i32_0 : i32, i32
  }
  func.func @transform_7(%arg0: i32) -> (i32, i32) {
    %c0_i32 = arith.constant 0 : i32
    %c0_i32_0 = arith.constant 0 : i32
    %c0_i32_1 = arith.constant 0 : i32
    return %c0_i32, %c0_i32_0 : i32, i32
  }
  func.func @transform_8(%arg0: i32) -> (i32, i32) {
    %c0_i32 = arith.constant 0 : i32
    %c0_i32_0 = arith.constant 0 : i32
    %c0_i32_1 = arith.constant 0 : i32
    return %c0_i32, %c0_i32_0 : i32, i32
  }
  func.func @transform_9(%arg0: i32) -> (i32, i32) {
    %c0_i32 = arith.constant 0 : i32
    %c0_i32_0 = arith.constant 0 : i32
    %c0_i32_1 = arith.constant 0 : i32
    return %c0_i32, %c0_i32_0 : i32, i32
  }
  func.func @transform_10(%arg0: i32) -> (i32, i32, i32) {
    %c0_i32 = arith.constant 0 : i32
    %c0_i32_0 = arith.constant 0 : i32
    %c0_i32_1 = arith.constant 0 : i32
    %c0_i32_2 = arith.constant 0 : i32
    return %c0_i32, %c0_i32_0, %c0_i32_1 : i32, i32, i32
  }
}

</mosaic_0001>

<bundles_post_ra>
// kernel: tile.17
= control target key start
LH: loop header
LB: loop body
LE: loop exit
PB: predicated region body
PF: predicated region fallthrough
CT: control target
= control target key end

     0   :  { %s22_s0 = inlined_call_operand.vmem [shape: f32[8], index: 0, kind: input, shape index: {}]   ;;  %s23_s1 = inlined_call_operand.vmem [shape: f32[2,8], index: 1, kind: output, shape index: {}]  }
   0x1   :  { %v4_v0 = vld [vmem:[%s22_s0] ss:$0 sm:$0xff] }
   0x2   :  { %5 = vst [vmem:[%s23_s1] sm:$0x3] %v4_v0 }

// kernel: tile.22
= control target key start
LH: loop header
LB: loop body
LE: loop exit
PB: predicated region body
PF: predicated region fallthrough
CT: control target
= control target key end

     0   :  { %vm7_vm0 = vcmask 64512   ;;  %vm13_vm1 = vcmask 130112   ;;  %s39_s0 = inlined_call_operand.vmem [shape: f32[2,8], index: 0, kind: input, shape index: {}]   ;;  %s40_s1 = inlined_call_operand.vmem [shape: f32[1,16], index: 1, kind: output, shape index: {}]  }
   0x1   :  { %v4_v0 = vld [vmem:[%s39_s0] sm:$0x3]  ;;  %s22_s0 = smov 8  }
   0x2   :  { %5 = vst [vmem:[#allocation1] sm:$0x3] %v4_v0 }
   0x9   :  { %v10_v1 = vld [vmem:[#allocation1 + $0x1] sm:$0x1]   ;;  %v6_v2 = vld [vmem:[#allocation1] sm:$0x1]  }
   0xa   :  { %11 = vrot.lane.b32.xlu0 %v10_v1, %s22_s0  ;;  %8 = vst.msk [vmem:[#allocation0] sm:$0x1] %vm7_vm0, %v6_v2  }
  0x7c   :  { %v12_v3 = vpop.permute.xlu0 %11  }
  0x7d   :  { %14 = vst.msk [vmem:[#allocation0] sm:$0x1] %vm13_vm1, %v12_v3  }
  0x84   :  { %v17_v4 = vld [vmem:[#allocation0] sm:$0x1] }
  0x85   :  { %20 = vst [vmem:[%s40_s1] sm:$0x1] %v17_v4 }

// kernel: tile.21
= control target key start
LH: loop header
LB: loop body
LE: loop exit
PB: predicated region body
PF: predicated region fallthrough
CT: control target
= control target key end

     0   :  { %s22_s0 = inlined_call_operand.vmem [shape: f32[16], index: 0, kind: input, shape index: {}]   ;;  %s23_s1 = inlined_call_operand.vmem [shape: f32[2,16], index: 1, kind: output, shape index: {}]  }
   0x1   :  { %v4_v0 = vld [vmem:[%s22_s0] ss:$0 sm:$0xff] }
   0x2   :  { %5 = vst [vmem:[%s23_s1] sm:$0x3] %v4_v0 }

// kernel: tile.23
= control target key start
LH: loop header
LB: loop body
LE: loop exit
PB: predicated region body
PF: predicated region fallthrough
CT: control target
= control target key end

     0   :  { %vm7_vm0 = vcmask 130048   ;;  %vm13_vm1 = vcmask 261248   ;;  %s39_s0 = inlined_call_operand.vmem [shape: f32[2,16], index: 0, kind: input, shape index: {}]   ;;  %s40_s1 = inlined_call_operand.vmem [shape: f32[1,32], index: 1, kind: output, shape index: {}]  }
   0x1   :  { %v4_v0 = vld [vmem:[%s39_s0] sm:$0x3]  ;;  %s22_s0 = smov 16  }
   0x2   :  { %5 = vst [vmem:[#allocation1] sm:$0x3] %v4_v0 }
   0x9   :  { %v10_v1 = vld [vmem:[#allocation1 + $0x1] sm:$0x1]   ;;  %v6_v2 = vld [vmem:[#allocation1] sm:$0x1]  }
   0xa   :  { %11 = vrot.lane.b32.xlu0 %v10_v1, %s22_s0  ;;  %8 = vst.msk [vmem:[#allocation0] sm:$0x1] %vm7_vm0, %v6_v2  }
  0x7c   :  { %v12_v3 = vpop.permute.xlu0 %11  }
  0x7d   :  { %14 = vst.msk [vmem:[#allocation0] sm:$0x1] %vm13_vm1, %v12_v3  }
  0x84   :  { %v17_v4 = vld [vmem:[#allocation0] sm:$0x1] }
  0x85   :  { %20 = vst [vmem:[%s40_s1] sm:$0x1] %v17_v4 }

// kernel: graph_block_forward.2
= control target key start
LH: loop header
LB: loop body
LE: loop exit
PB: predicated region body
PF: predicated region fallthrough
CT: control target
= control target key end

     0   :  { %s926_s27 = smov 0   ;;  %s1038_s0 = inlined_call_operand.vmem [shape: bf16[64,2], index: 0, kind: input, shape index: {}]   ;;  %s1039_s1 = inlined_call_operand.vmem [shape: bf16[2,16], index: 1, kind: input, shape index: {}]   ;;  %s1040_s2 = inlined_call_operand.vmem [shape: f32[1,16], index: 2, kind: input, shape index: {}]   ;;  %s1041_s3 = inlined_call_operand.vmem [shape: bf16[16,32], index: 3, kind: input, shape index: {}]   ;;  %s1042_s4 = inlined_call_operand.vmem [shape: f32[1,32], index: 4, kind: input, shape index: {}]   ;;  %s1043_s5 = inlined_call_operand.vmem [shape: bf16[32,256], index: 5, kind: input, shape index: {}]   ;;  %s1044_s6 = inlined_call_operand.vmem [shape: bf16[256,128], index: 6, kind: input, shape index: {}]   ;;  %s1045_s7 = inlined_call_operand.vmem [shape: f32[1,128], index: 7, kind: input, shape index: {}]   ;;  %s1046_s8 = inlined_call_operand.vmem [shape: f32[64,128], index: 8, kind: output, shape index: {}]  }
   0x1 LB: > { %s712_s28 = sadd.s32 4294967295, %s879_s27   ;;  %p716_p0 = scmp.ge.s32.totalorder %s879_s27, 1  ;;  %s879_s27 = sphi %s926_s27, %s18_s27  }
   0x2   : > { %p263_p1 = scmp.lt.s32.totalorder %s879_s27, 3 }
   0x4   : > { %p264_p2 = pnand %p716_p0, %p263_p1 }
   0x5   : > { %s717_s9 = sshll.u32 (!%p264_p2), %s712_s28, 2 }
   0x6   : > { %267 = sbr.rel (%p264_p2) target bundleno = 599 (0x257), region = 52  ;;  %p298_p3 = scmp.lt.s32.totalorder (!%p264_p2), %s717_s9, 7 }
   0xb   : > { %v314_v0 = vld [vmem:[%s1039_s1] sm:$0x1]  ;;  %vm336_vm0 = vcmask 1040384   ;;  %s1048_s9 = smov (!%p298_p3, %s717_s9), 7  ;;  %vm329_vm1 = vcmask 15360   ;;  %vm377_vm2 = vcmask 130048  }
   0xc   : > { %v338_v1 = vsel %vm336_vm0, %v314_v0, 0  ;;  %s718_s10 = sshll.u32 %s1048_s9, 2  ;;  %v825_v4 = vld [vmem:[%s1041_s3] sm:$0xff]  ;;  %v747_v20 = vld [vmem:[%s1043_s5 + $0x10] sm:$0xf]  ;;  %v837_v32 = vld [vmem:[%s1044_s6 + $0x38] sm:$0xff] }
   0xd   : > { %347 = vmatpush.bf16.msra.mxu0 %v338_v1  ;;  %s301_s13 = scalar_lea.vmem %s1038_s0, %s718_s10  ;;  %391 = vmatpush.bf16.msra.mxu1 %v825_v4  ;;  %v870_v6 = vld [vmem:[%s1040_s2] ss:$0 sm:$0xff]  ;;  %v829_v21 = vld [vmem:[%s1043_s5 + $0x14] sm:$0xf0]  ;;  %v828_v22 = vld [vmem:[%s1043_s5 + $0x14] sm:$0xf] }
   0xe   : > { %v823_v2 = vld [vmem:[%s301_s13] sm:$0xff]  ;;  %v824_v3 = vld [vmem:[%s301_s13 + $0x8] sm:$0xff]  ;;  %v748_v23 = vor.u32 %v829_v21, %v747_v20  ;;  %v749_v24 = vld [vmem:[%s1043_s5 + $0x18] sm:$0xf0]  ;;  %vm433_vm3 = vcmask 261120   ;;  %s720_s10 = sshll.u32 %s1048_s9, 3 }
   0xf   : > { %v752_v25 = vor.u32 %v828_v22, %v749_v24  ;;  %v739_v26 = vld [vmem:[%s1043_s5] sm:$0xf]  ;;  %v827_v27 = vld [vmem:[%s1043_s5 + $0x4] sm:$0xf0]  ;;  %v826_v28 = vld [vmem:[%s1043_s5 + $0x4] sm:$0xf]  ;;  %s307_s13 = scalar_lea.vmem %s1046_s8, %s720_s10 }
  0x10   : > { %729 = vmatmul.msk.bf16.vlgmr.msra.gmra.mxu0 %vm329_vm1, %v823_v2  ;;  %446 = vmatpush.bf16.msra.mxu2 %v748_v23  ;;  %v740_v29 = vor.u32 %v827_v27, %v739_v26  ;;  %v741_v30 = vld [vmem:[%s1043_s5 + $0x8] sm:$0xf0]  ;;  %v845_v33 = vld [vmem:[%s1044_s6 + $0x78] sm:$0xff]  ;;  %v836_v35 = vld [vmem:[%s1044_s6 + $0x30] sm:$0xff] }
  0x11   : > { %465 = vmatpush.bf16.msra.mxu3 %v752_v25  ;;  %v744_v31 = vor.u32 %v826_v28, %v741_v30  ;;  %614 = vmatpush.bf16.msrb.mxu0 %v837_v32  ;;  %v844_v36 = vld [vmem:[%s1044_s6 + $0x70] sm:$0xff]  ;;  %v871_v37 = vld [vmem:[%s1042_s4] ss:$0 sm:$0xff]  ;;  %v835_v38 = vld [vmem:[%s1044_s6 + $0x28] sm:$0xff] }
  0x12   : > { %633 = vmatpush.bf16.msrb.mxu1 %v845_v33  ;;  %v843_v39 = vld [vmem:[%s1044_s6 + $0x68] sm:$0xff]  ;;  %v834_v43 = vld [vmem:[%s1044_s6 + $0x20] sm:$0xff]  ;;  %v833_v48 = vld [vmem:[%s1044_s6 + $0x18] sm:$0xff] }
  0x13   : > { %v842_v44 = vld [vmem:[%s1044_s6 + $0x60] sm:$0xff]  ;;  %v841_v49 = vld [vmem:[%s1044_s6 + $0x58] sm:$0xff]  ;;  %v832_v57 = vld [vmem:[%s1044_s6 + $0x10] sm:$0xff] }
  0x14   : > { %447 = vmatpush.bf16.msra.mxu2 %v740_v29  ;;  %v840_v58 = vld [vmem:[%s1044_s6 + $0x50] sm:$0xff]  ;;  %v831_v59 = vld [vmem:[%s1044_s6 + $0x8] sm:$0xff]  ;;  %v830_v61 = vld [vmem:[%s1044_s6] sm:$0xff] }
  0x15   : > { %466 = vmatpush.bf16.msra.mxu3 %v744_v31  ;;  %615 = vmatpush.bf16.msrb.mxu0 %v836_v35  ;;  %v839_v60 = vld [vmem:[%s1044_s6 + $0x48] sm:$0xff]  ;;  %v838_v62 = vld [vmem:[%s1044_s6 + $0x40] sm:$0xff] }
  0x16   : > { %634 = vmatpush.bf16.msrb.mxu1 %v844_v36 }
  0x18   : > { %846 = vmatpush.bf16.msrb.mxu2 %v837_v32 }
  0x19   : > { %854 = vmatpush.bf16.msrb.mxu3 %v845_v33  ;;  %616 = vmatpush.bf16.msrb.mxu0 %v835_v38 }
  0x1a   : > { %635 = vmatpush.bf16.msrb.mxu1 %v843_v39 }
  0x1c   : > { %847 = vmatpush.bf16.msrb.mxu2 %v836_v35 }
  0x1d   : > { %855 = vmatpush.bf16.msrb.mxu3 %v844_v36  ;;  %617 = vmatpush.bf16.msrb.mxu0 %v834_v43 }
  0x1e   : > { %636 = vmatpush.bf16.msrb.mxu1 %v842_v44 }
  0x20   : > { %730 = vmatmul.msk.bf16.gmra.mxu0 %vm329_vm1, %v824_v3  ;;  %848 = vmatpush.bf16.msrb.mxu2 %v835_v38 }
  0x21   : > { %856 = vmatpush.bf16.msrb.mxu3 %v843_v39  ;;  %618 = vmatpush.bf16.msrb.mxu0 %v833_v48 }
  0x22   : > { %637 = vmatpush.bf16.msrb.mxu1 %v841_v49 }
  0x24   : > { %849 = vmatpush.bf16.msrb.mxu2 %v834_v43 }
  0x25   : > { %857 = vmatpush.bf16.msrb.mxu3 %v842_v44  ;;  %619 = vmatpush.bf16.msrb.mxu0 %v832_v57 }
  0x26   : > { %638 = vmatpush.bf16.msrb.mxu1 %v840_v58 }
  0x28   : > { %850 = vmatpush.bf16.msrb.mxu2 %v833_v48 }
  0x29   : > { %858 = vmatpush.bf16.msrb.mxu3 %v841_v49  ;;  %620 = vmatpush.bf16.msrb.mxu0 %v831_v59 }
  0x2a   : > { %639 = vmatpush.bf16.msrb.mxu1 %v839_v60 }
  0x2c   : > { %851 = vmatpush.bf16.msrb.mxu2 %v832_v57 }
  0x2d   : > { %859 = vmatpush.bf16.msrb.mxu3 %v840_v58  ;;  %621 = vmatpush.bf16.msrb.mxu0 %v830_v61 }
  0x2e   : > { %640 = vmatpush.bf16.msrb.mxu1 %v838_v62 }
  0x30   : > { %852 = vmatpush.bf16.msrb.mxu2 %v831_v59 }
  0x31   : > { %860 = vmatpush.bf16.msrb.mxu3 %v839_v60 }
  0x34   : > { %853 = vmatpush.bf16.msrb.mxu2 %v830_v61 }
  0x35   : > { %861 = vmatpush.bf16.msrb.mxu3 %v838_v62 }
  0x8d   : > { %v349_v5 = vpop.f32.mrf.mxu0 }
  0x8e   : > { %v350_v7 = vadd.f32 %v870_v6, %v349_v5 }
  0x90   : > { %v359_v10 = vmax.f32 %v350_v7, 0.0 }
  0x95   : > { %v351_v8 = vpop.f32.mrf.mxu0 }
  0x96   : > { %v352_v9 = vadd.f32 %v870_v6, %v351_v8 }
  0x98   : > { %v360_v11 = vmax.f32 %v352_v9, 0.0 }
  0x9a   : > { %v363_v12 = vpack.c.bf16 %v360_v11, %v359_v10  ;;  %v872_v11 = vld [vmem:[%s1045_s7] ss:$0 sm:$0xff] }
  0x9c   : > { %735 = vmatmul.msk.bf16.vlgmr.msra.gmra.mxu1 %vm377_vm2, %v363_v12 }
  0x9d   : > { %v354_v13 = vpop.f32.mrf.mxu0 }
  0x9e   : > { %v355_v14 = vadd.f32 %v870_v6, %v354_v13 }
  0xa0   : > { %v361_v17 = vmax.f32 %v355_v14, 0.0 }
  0xa5   : > { %v356_v15 = vpop.f32.mrf.mxu0 }
  0xa6   : > { %v357_v16 = vadd.f32 %v870_v6, %v356_v15 }
  0xa8   : > { %v362_v18 = vmax.f32 %v357_v16, 0.0 }
  0xaa   : > { %v364_v19 = vpack.c.bf16 %v362_v18, %v361_v17 }
  0xac   : > { %736 = vmatmul.msk.bf16.gmra.mxu1 %vm377_vm2, %v364_v19 }
 0x119   : > { %v393_v34 = vpop.f32.mrf.mxu1 }
 0x11a   : > { %v394_v40 = vadd.f32 %v871_v37, %v393_v34 }
 0x11c   : > { %v403_v45 = vmax.f32 %v394_v40, 0.0 }
 0x121   : > { %v395_v41 = vpop.f32.mrf.mxu1 }
 0x122   : > { %v396_v42 = vadd.f32 %v871_v37, %v395_v41 }
 0x124   : > { %v404_v46 = vmax.f32 %v396_v42, 0.0 }
 0x126   : > { %v407_v47 = vpack.c.bf16 %v404_v46, %v403_v45 }
 0x128   : > { %753 = vmatmul.msk.bf16.vlgmr.msra.gmra.mxu2 %vm433_vm3, %v407_v47  ;;  %755 = vmatmul.msk.bf16.vlgmr.msra.gmra.mxu3 %vm433_vm3, %v407_v47 }
 0x129   : > { %v398_v50 = vpop.f32.mrf.mxu1 }
 0x12a   : > { %v399_v51 = vadd.f32 %v871_v37, %v398_v50 }
 0x12c   : > { %v405_v54 = vmax.f32 %v399_v51, 0.0 }
 0x131   : > { %v400_v52 = vpop.f32.mrf.mxu1 }
 0x132   : > { %v401_v53 = vadd.f32 %v871_v37, %v400_v52 }
 0x134   : > { %v406_v55 = vmax.f32 %v401_v53, 0.0 }
 0x136   : > { %v408_v56 = vpack.c.bf16 %v406_v55, %v405_v54 }
 0x138   : > { %754 = vmatmul.msk.bf16.gmra.mxu2 %vm433_vm3, %v408_v56  ;;  %756 = vmatmul.msk.bf16.gmra.mxu3 %vm433_vm3, %v408_v56 }
 0x1ab   : > { %v449_v63 = vpop.f32.mrf.mxu2  ;;  %v468_v0 = vpop.f32.mrf.mxu3 }
 0x1b3   : > { %v451_v1 = vpop.f32.mrf.mxu2  ;;  %v470_v2 = vpop.f32.mrf.mxu3 }
 0x1b4   : > { %v478_v3 = vpack.c.bf16 %v451_v1, %v449_v63  ;;  %v479_v4 = vpack.c.bf16 %v470_v2, %v468_v0 }
 0x1b6   : > { %622 = vmatmul.bf16.vlgmr.msrb.gmra.mxu0 %v478_v3  ;;  %641 = vmatmul.bf16.vlgmr.msrb.gmra.mxu1 %v479_v4 }
 0x1bb   : > { %v454_v5 = vpop.f32.mrf.mxu2  ;;  %v473_v6 = vpop.f32.mrf.mxu3 }
 0x1c3   : > { %v456_v7 = vpop.f32.mrf.mxu2  ;;  %v475_v8 = vpop.f32.mrf.mxu3 }
 0x1c4   : > { %v480_v9 = vpack.c.bf16 %v456_v7, %v454_v5  ;;  %v481_v10 = vpack.c.bf16 %v475_v8, %v473_v6 }
 0x1c6   : > { %627 = vmatmul.bf16.vlgmr.msrb.gmra.mxu2 %v480_v9  ;;  %646 = vmatmul.bf16.vlgmr.msrb.gmra.mxu3 %v481_v10 }
 0x233   : > { %v623_v12 = vpop.f32.mrf.mxu0  ;;  %v642_v13 = vpop.f32.mrf.mxu1 }
 0x234   : > { %v624_v14 = vadd.f32 %v872_v11, %v623_v12 }
 0x236   : > { %v643_v15 = vadd.f32 %v642_v13, %v624_v14 }
 0x238   : > { %652 = vst [vmem:[%s307_s13] sm:$0xff] %v643_v15 }
 0x23b   : > { %v625_v16 = vpop.f32.mrf.mxu0  ;;  %v644_v18 = vpop.f32.mrf.mxu1 }
 0x23c   : > { %v626_v17 = vadd.f32 %v872_v11, %v625_v16 }
 0x23e   : > { %v645_v19 = vadd.f32 %v644_v18, %v626_v17 }
 0x240   : > { %653 = vst [vmem:[%s307_s13 + $0x8] sm:$0xff] %v645_v19 }
 0x249   : > { %v628_v20 = vpop.f32.mrf.mxu2  ;;  %v647_v21 = vpop.f32.mrf.mxu3 }
 0x24a   : > { %v629_v22 = vadd.f32 %v872_v11, %v628_v20 }
 0x24c   : > { %v648_v23 = vadd.f32 %v647_v21, %v629_v22 }
 0x24e   : > { %654 = vst [vmem:[%s307_s13 + $0x10] sm:$0xff] %v648_v23 }
 0x251   : > { %v630_v24 = vpop.f32.mrf.mxu2  ;;  %v649_v26 = vpop.f32.mrf.mxu3 }
 0x252   : > { %v631_v25 = vadd.f32 %v872_v11, %v630_v24 }
 0x254   : > { %v650_v27 = vadd.f32 %v649_v26, %v631_v25 }
 0x256   : > { %655 = vst [vmem:[%s307_s13 + $0x18] sm:$0xff] %v650_v27 }
 0x257 PF: > { %s18_s27 = sadd.s32 1, %s879_s27  }
 0x258   : > { %p15_p4 = scmp.ge.s32.totalorder %s18_s27, 4  }
 0x25a   :  { %17 = sbr.rel (!%p15_p4) target bundleno = 1 (0x1), region = 82 }

// kernel: graph_block_forward.3
= control target key start
LH: loop header
LB: loop body
LE: loop exit
PB: predicated region body
PF: predicated region fallthrough
CT: control target
= control target key end

     0   :  { %v2033_v15 = vmov 64.0   ;;  %vm566_vm4 = vcmask 27648   ;;  %vm971_vm5 = vcmask 1041408   ;;  %vm967_vm11 = vcmask 31744   ;;  %s2879_s0 = inlined_call_operand.vmem [shape: f32[2,8,4,128], index: 0, kind: input, shape index: {}]   ;;  %s2880_s1 = inlined_call_operand.vmem [shape: f32[16,1,128], index: 1, kind: input, shape index: {}]   ;;  %s2881_s2 = inlined_call_operand.vmem [shape: bf16[128,128], index: 2, kind: input, shape index: {}]   ;;  %s2882_s3 = inlined_call_operand.vmem [shape: f32[1,128], index: 3, kind: input, shape index: {}]   ;;  %s2883_s5 = inlined_call_operand.vmem [shape: f32[1,128], index: 5, kind: input, shape index: {}]   ;;  %s2884_s4 = inlined_call_operand.vmem [shape: bf16[128,128], index: 4, kind: input, shape index: {}]   ;;  %s2885_s6 = inlined_call_operand.vmem [shape: bf16[128,128], index: 6, kind: input, shape index: {}]   ;;  %s2886_s7 = inlined_call_operand.vmem [shape: f32[1,128], index: 7, kind: input, shape index: {}]   ;;  %s2887_s8 = inlined_call_operand.vmem [shape: bf16[128,128], index: 8, kind: input, shape index: {}]   ;;  %s2888_s9 = inlined_call_operand.vmem [shape: f32[1,128], index: 9, kind: input, shape index: {}]   ;;  %s2889_s10 = inlined_call_operand.vmem [shape: f32[2,4,128], index: 10, kind: output, shape index: {}]  }
   0x1   :  { %v2093_v0 = vld [vmem:[%s2879_s0] sm:$0xf]  ;;  %v2098_v1 = vld [vmem:[%s2879_s0 + $0x4] sm:$0xf]  ;;  %v2103_v2 = vld [vmem:[%s2879_s0 + $0x8] sm:$0xf]  ;;  %1963 = vrcp.f32 %v2033_v15 }
   0x2   :  { %v2108_v3 = vld [vmem:[%s2879_s0 + $0xc] sm:$0xf]  ;;  %v2113_v4 = vld [vmem:[%s2879_s0 + $0x10] sm:$0xf]  ;;  %v2118_v5 = vld [vmem:[%s2879_s0 + $0x14] sm:$0xf] }
   0x3   :  { %68 = vst [vmem:[#allocation1] ss:$2 sm:$0xff] %v2093_v0  ;;  %v2124_v6 = vld [vmem:[%s2879_s0 + $0x18] sm:$0xf]  ;;  %v2130_v7 = vld [vmem:[%s2879_s0 + $0x1c] sm:$0xf] }
   0x4   :  { %70 = vst [vmem:[#allocation1 + $0x1] ss:$2 sm:$0xff] %v2098_v1  ;;  %v2137_v8 = vld [vmem:[%s2879_s0 + $0x20] sm:$0xf]  ;;  %v2143_v9 = vld [vmem:[%s2879_s0 + $0x24] sm:$0xf] }
   0x5   :  { %72 = vst [vmem:[#allocation1 + $0x10] ss:$2 sm:$0xff] %v2103_v2  ;;  %v2149_v10 = vld [vmem:[%s2879_s0 + $0x28] sm:$0xf]  ;;  %v2155_v11 = vld [vmem:[%s2879_s0 + $0x2c] sm:$0xf] }
   0x6   :  { %74 = vst [vmem:[#allocation1 + $0x11] ss:$2 sm:$0xff] %v2108_v3  ;;  %v2161_v12 = vld [vmem:[%s2879_s0 + $0x30] sm:$0xf]  ;;  %v2168_v16 = vld [vmem:[%s2879_s0 + $0x34] sm:$0xf] }
   0x7   :  { %76 = vst [vmem:[#allocation1 + $0x20] ss:$2 sm:$0xff] %v2113_v4  ;;  %v2173_v17 = vld [vmem:[%s2879_s0 + $0x38] sm:$0xf]  ;;  %v2180_v20 = vld [vmem:[%s2879_s0 + $0x3c] sm:$0xf]  ;;  %v1964_v24 = vpop.eup %1963 }
   0x8   :  { %78 = vst [vmem:[#allocation1 + $0x21] ss:$2 sm:$0xff] %v2118_v5  ;;  %v121_v28 = vmul.f32 64.0, %v1964_v24  ;;  %vm125_vm0 = vweird.f32 %v1964_v24 }
   0x9   :  { %80 = vst [vmem:[#allocation1 + $0x30] ss:$2 sm:$0xff] %v2124_v6 }
   0xa   :  { %82 = vst [vmem:[#allocation1 + $0x31] ss:$2 sm:$0xff] %v2130_v7  ;;  %v122_v33 = vsub.f32 1.0, %v121_v28 }
   0xb   :  { %v83_v13 = vld.sshfl [vmem:[#allocation1] sm:$0xff pattern:$0x75316420] }
   0xc   :  { %87 = vst [vmem:[#allocation1] ss:$2 sm:$0xff] %v2137_v8  ;;  %v123_v36 = vmul.f32 %v1964_v24, %v122_v33 }
   0xd   :  { %v84_v14 = vld.sshfl [vmem:[#allocation1 + $0x10] sm:$0xff pattern:$0x75316420]  ;;  %88 = vst [vmem:[#allocation1 + $0x1] ss:$2 sm:$0xff] %v2143_v9 }
   0xe   :  { %89 = vst [vmem:[#allocation1 + $0x10] ss:$2 sm:$0xff] %v2149_v10  ;;  %v107_v18 = vadd.f32 %v84_v14, %v83_v13  ;;  %v124_v39 = vadd.f32 %v1964_v24, %v123_v36 }
   0xf   :  { %v85_v19 = vld.sshfl [vmem:[#allocation1 + $0x20] sm:$0xff pattern:$0x75316420]  ;;  %90 = vst [vmem:[#allocation1 + $0x11] ss:$2 sm:$0xff] %v2155_v11 }
  0x10   :  { %91 = vst [vmem:[#allocation1 + $0x20] ss:$2 sm:$0xff] %v2161_v12  ;;  %v108_v21 = vadd.f32 %v107_v18, %v85_v19  ;;  %v2186_v42 = vsel %vm125_vm0, %v1964_v24, %v124_v39 }
  0x11   :  { %v86_v22 = vld.sshfl [vmem:[#allocation1 + $0x30] sm:$0xff pattern:$0x75316420]  ;;  %92 = vst [vmem:[#allocation1 + $0x21] ss:$2 sm:$0xff] %v2168_v16 }
  0x12   :  { %93 = vst [vmem:[#allocation1 + $0x30] ss:$2 sm:$0xff] %v2173_v17  ;;  %v109_v23 = vadd.f32 %v108_v21, %v86_v22 }
  0x13   :  { %94 = vst [vmem:[#allocation1 + $0x31] ss:$2 sm:$0xff] %v2180_v20 }
  0x14   :  { %v95_v25 = vld.sshfl [vmem:[#allocation1] sm:$0xff pattern:$0x75316420] }
  0x15   :  { %v110_v26 = vadd.f32 %v109_v23, %v95_v25 }
  0x16   :  { %v96_v27 = vld.sshfl [vmem:[#allocation1 + $0x10] sm:$0xff pattern:$0x75316420] }
  0x17   :  { %v111_v29 = vadd.f32 %v110_v26, %v96_v27 }
  0x18   :  { %v97_v30 = vld.sshfl [vmem:[#allocation1 + $0x20] sm:$0xff pattern:$0x75316420] }
  0x19   :  { %v112_v31 = vadd.f32 %v111_v29, %v97_v30 }
  0x1a   :  { %v98_v32 = vld.sshfl [vmem:[#allocation1 + $0x30] sm:$0xff pattern:$0x75316420] }
  0x1b   :  { %v113_v34 = vadd.f32 %v112_v31, %v98_v32 }
  0x1d   :  { %v114_v35 = vrot.slane %v113_v34, 4 }
  0x1f   :  { %v115_v37 = vadd.f32 %v114_v35, %v113_v34 }
  0x21   :  { %v116_v38 = vrot.slane %v115_v37, 2 }
  0x23   :  { %v117_v40 = vadd.f32 %v116_v38, %v115_v37 }
  0x25   :  { %v118_v41 = vrot.slane %v117_v40, 1 }
  0x27   :  { %v119_v43 = vadd.f32 %v118_v41, %v117_v40 }
  0x29   :  { %v127_v44 = vmul.f32 %v2186_v42, %v119_v43 }
  0x2b   :  { %v129_v45 = vrot.slane %v127_v44, 4  ;;  %v2190_v46 = vsub.f32 %v2093_v0, %v127_v44  ;;  %v2193_v47 = vsub.f32 %v2103_v2, %v127_v44  ;;  %v2202_v50 = vsub.f32 %v2113_v4, %v127_v44 }
  0x2c   :  { %v2208_v52 = vsub.f32 %v2124_v6, %v127_v44  ;;  %v2224_v59 = vsub.f32 %v2137_v8, %v127_v44  ;;  %v2234_v63 = vsub.f32 %v2149_v10, %v127_v44  ;;  %v2242_v2 = vsub.f32 %v2161_v12, %v127_v44 }
  0x2d   :  { %v2196_v48 = vsub.f32 %v2098_v1, %v129_v45  ;;  %v2199_v49 = vsub.f32 %v2108_v3, %v129_v45  ;;  %v2205_v51 = vsub.f32 %v2118_v5, %v129_v45  ;;  %v147_v53 = vmul.f32 %v2190_v46, %v2190_v46 }
  0x2e   :  { %v149_v55 = vmul.f32 %v2193_v47, %v2193_v47  ;;  %v2217_v56 = vsub.f32 %v2130_v7, %v129_v45  ;;  %v151_v58 = vmul.f32 %v2202_v50, %v2202_v50  ;;  %v2229_v61 = vsub.f32 %v2143_v9, %v129_v45 }
  0x2f   :  { %v148_v54 = vmul.f32 %v2196_v48, %v2196_v48  ;;  %v150_v57 = vmul.f32 %v2199_v49, %v2199_v49  ;;  %179 = vst [vmem:[#allocation1] ss:$2 sm:$0xff] %v147_v53  ;;  %v152_v60 = vmul.f32 %v2205_v51, %v2205_v51  ;;  %v153_v62 = vmul.f32 %v2208_v52, %v2208_v52  ;;  %v1947_v53 = vld [vmem:[%s2880_s1 + $0x4] ss:$0 sm:$0xff] }
  0x30   :  { %183 = vst [vmem:[#allocation1 + $0x10] ss:$2 sm:$0xff] %v149_v55  ;;  %v154_v0 = vmul.f32 %v2217_v56, %v2217_v56  ;;  %v2239_v1 = vsub.f32 %v2155_v11, %v129_v45  ;;  %v155_v3 = vmul.f32 %v2224_v59, %v2224_v59  ;;  %v2247_v4 = vsub.f32 %v2168_v16, %v129_v45 }
  0x31   :  { %181 = vst [vmem:[#allocation1 + $0x1] ss:$2 sm:$0xff] %v148_v54  ;;  %v156_v5 = vmul.f32 %v2229_v61, %v2229_v61  ;;  %v2252_v6 = vsub.f32 %v2173_v17, %v127_v44  ;;  %v157_v7 = vmul.f32 %v2234_v63, %v2234_v63  ;;  %v2257_v8 = vsub.f32 %v2180_v20, %v129_v45  ;;  %v1943_v44 = vld [vmem:[%s2880_s1] ss:$0 sm:$0xff]  ;;  %v1944_v45 = vld [vmem:[%s2880_s1 + $0x2] ss:$0 sm:$0xff] }
  0x32   :  { %185 = vst [vmem:[#allocation1 + $0x11] ss:$2 sm:$0xff] %v150_v57  ;;  %v158_v9 = vmul.f32 %v2239_v1, %v2239_v1  ;;  %v159_v11 = vmul.f32 %v2242_v2, %v2242_v2  ;;  %v160_v12 = vmul.f32 %v2247_v4, %v2247_v4 }
  0x33   :  { %187 = vst [vmem:[#allocation1 + $0x20] ss:$2 sm:$0xff] %v151_v58  ;;  %v161_v14 = vmul.f32 %v2252_v6, %v2252_v6  ;;  %v162_v16 = vmul.f32 %v2257_v8, %v2257_v8  ;;  %v1945_v58 = vld [vmem:[%s2880_s1 + $0x3] ss:$0 sm:$0xff] }
  0x34   :  { %189 = vst [vmem:[#allocation1 + $0x21] ss:$2 sm:$0xff] %v152_v60  ;;  %v1946_v60 = vld [vmem:[%s2880_s1 + $0x1] ss:$0 sm:$0xff] }
  0x35   :  { %191 = vst [vmem:[#allocation1 + $0x30] ss:$2 sm:$0xff] %v153_v62 }
  0x36   :  { %193 = vst [vmem:[#allocation1 + $0x31] ss:$2 sm:$0xff] %v154_v0 }
  0x38   :  { %v194_v10 = vld.sshfl [vmem:[#allocation1] sm:$0xff pattern:$0x75316420] }
  0x39   :  { %198 = vst [vmem:[#allocation1] ss:$2 sm:$0xff] %v155_v3  ;;  %v195_v13 = vld.sshfl [vmem:[#allocation1 + $0x10] sm:$0xff pattern:$0x75316420] }
  0x3a   :  { %199 = vst [vmem:[#allocation1 + $0x1] ss:$2 sm:$0xff] %v156_v5  ;;  %v218_v15 = vadd.f32 %v195_v13, %v194_v10  ;;  %v1950_v3 = vld [vmem:[%s2880_s1 + $0x6] ss:$0 sm:$0xff] }
  0x3b   :  { %200 = vst [vmem:[#allocation1 + $0x10] ss:$2 sm:$0xff] %v157_v7  ;;  %v196_v17 = vld.sshfl [vmem:[#allocation1 + $0x20] sm:$0xff pattern:$0x75316420] }
  0x3c   :  { %201 = vst [vmem:[#allocation1 + $0x11] ss:$2 sm:$0xff] %v158_v9  ;;  %v219_v18 = vadd.f32 %v218_v15, %v196_v17 }
  0x3d   :  { %202 = vst [vmem:[#allocation1 + $0x20] ss:$2 sm:$0xff] %v159_v11  ;;  %v197_v19 = vld.sshfl [vmem:[#allocation1 + $0x30] sm:$0xff pattern:$0x75316420] }
  0x3e   :  { %203 = vst [vmem:[#allocation1 + $0x21] ss:$2 sm:$0xff] %v160_v12  ;;  %v220_v20 = vadd.f32 %v219_v18, %v197_v19 }
  0x3f   :  { %204 = vst [vmem:[#allocation1 + $0x30] ss:$2 sm:$0xff] %v161_v14 }
  0x40   :  { %205 = vst [vmem:[#allocation1 + $0x31] ss:$2 sm:$0xff] %v162_v16 }
  0x41   :  { %v206_v21 = vld.sshfl [vmem:[#allocation1] sm:$0xff pattern:$0x75316420] }
  0x42   :  { %v221_v22 = vadd.f32 %v220_v20, %v206_v21 }
  0x43   :  { %v207_v23 = vld.sshfl [vmem:[#allocation1 + $0x10] sm:$0xff pattern:$0x75316420] }
  0x44   :  { %v222_v24 = vadd.f32 %v221_v22, %v207_v23  ;;  %v1952_v23 = vld [vmem:[%s2880_s1 + $0x8] ss:$0 sm:$0xff] }
  0x45   :  { %v208_v25 = vld.sshfl [vmem:[#allocation1 + $0x20] sm:$0xff pattern:$0x75316420] }
  0x46   :  { %v223_v26 = vadd.f32 %v222_v24, %v208_v25 }
  0x47   :  { %v209_v27 = vld.sshfl [vmem:[#allocation1 + $0x30] sm:$0xff pattern:$0x75316420] }
  0x48   :  { %v224_v28 = vadd.f32 %v223_v26, %v209_v27 }
  0x4a   :  { %v225_v29 = vrot.slane %v224_v28, 4 }
  0x4c   :  { %v226_v30 = vadd.f32 %v225_v29, %v224_v28  ;;  %v1953_v28 = vld [vmem:[%s2880_s1 + $0xa] ss:$0 sm:$0xff] }
  0x4e   :  { %v227_v31 = vrot.slane %v226_v30, 2 }
  0x50   :  { %v228_v32 = vadd.f32 %v227_v31, %v226_v30  ;;  %v1954_v30 = vld [vmem:[%s2880_s1 + $0xf] ss:$0 sm:$0xff] }
  0x52   :  { %v229_v33 = vrot.slane %v228_v32, 1 }
  0x54   :  { %v230_v34 = vadd.f32 %v229_v33, %v228_v32 }
  0x56   :  { %v231_v35 = vmul.f32 %v230_v34, %v2186_v42 }
  0x58   :  { %v232_v36 = vadd.f32 1e-05, %v231_v35 }
  0x5a   :  { %1965 = vrsqrt.f32 %v232_v36  ;;  %vm239_vm1 = vweird.f32 %v232_v36 }
  0x60   :  { %v1966_v37 = vpop.eup %1965 }
  0x61   :  { %v234_v38 = vmul.f32 %v1966_v37, %v232_v36  ;;  %vm240_vm2 = vweird.f32 %v1966_v37  ;;  %v1956_v36 = vld [vmem:[%s2880_s1 + $0xc] ss:$0 sm:$0xff] }
  0x62   :  { %vm241_vm3 = vmor %vm239_vm1, %vm240_vm2 }
  0x63   :  { %v235_v39 = vmul.f32 %v1966_v37, %v234_v38 }
  0x65   :  { %v236_v40 = vmul.f32 0.5, %v235_v39 }
  0x67   :  { %v237_v41 = vsub.f32 1.5, %v236_v40  ;;  %v1957_v40 = vld [vmem:[%s2880_s1 + $0xe] ss:$0 sm:$0xff] }
  0x69   :  { %v238_v43 = vmul.f32 %v1966_v37, %v237_v41 }
  0x6b   :  { %v2276_v42 = vsel %vm241_vm3, %v1966_v37, %v238_v43 }
  0x6c   :  { %v246_v54 = vmul.f32 %v2276_v42, %v2190_v46  ;;  %v248_v55 = vmul.f32 %v2276_v42, %v2193_v47  ;;  %v2286_v57 = vrot.slane %v2276_v42, 4  ;;  %v250_v62 = vmul.f32 %v2276_v42, %v2202_v50  ;;  %v1948_v46 = vld [vmem:[%s2880_s1 + $0x7] ss:$0 sm:$0xff]  ;;  %v1949_v47 = vld [vmem:[%s2880_s1 + $0x5] ss:$0 sm:$0xff] }
  0x6d   :  { %v252_v0 = vmul.f32 %v2276_v42, %v2208_v52  ;;  %v254_v22 = vmul.f32 %v2276_v42, %v2224_v59  ;;  %v256_v59 = vmul.f32 %v2276_v42, %v2234_v63  ;;  %v258_v35 = vmul.f32 %v2276_v42, %v2242_v2 }
  0x6e   :  { %v326_v5 = vadd.f32 %v1943_v44, %v246_v54  ;;  %v328_v7 = vadd.f32 %v1944_v45, %v248_v55  ;;  %v249_v50 = vmul.f32 %v2286_v57, %v2199_v49  ;;  %v247_v9 = vmul.f32 %v2286_v57, %v2196_v48  ;;  %v1951_v49 = vld [vmem:[%s2880_s1 + $0xb] ss:$0 sm:$0xff]  ;;  %v1958_v44 = vld [vmem:[%s2880_s1 + $0xd] ss:$0 sm:$0xff] }
  0x6f   :  { %v330_v10 = vadd.f32 %v1947_v53, %v250_v62  ;;  %v253_v11 = vmul.f32 %v2286_v57, %v2217_v56  ;;  %v251_v12 = vmul.f32 %v2286_v57, %v2205_v51  ;;  %v332_v18 = vadd.f32 %v1950_v3, %v252_v0 }
  0x70   :  { %v2315_v52 = vpack.c.bf16 %v326_v5, %v326_v5  ;;  %v2317_v13 = vpack.c.bf16 %v328_v7, %v328_v7  ;;  %v329_v14 = vadd.f32 %v1945_v58, %v249_v50  ;;  %v327_v15 = vadd.f32 %v1946_v60, %v247_v9 }
  0x71   :  { %v2322_v16 = vpack.c.bf16 %v330_v10, %v330_v10  ;;  %v333_v48 = vadd.f32 %v1948_v46, %v253_v11  ;;  %v331_v17 = vadd.f32 %v1949_v47, %v251_v12  ;;  %v257_v19 = vmul.f32 %v2286_v57, %v2239_v1 }
  0x72   :  { %365 = vmatpush.bf16.xpose.msra.mxu1 %v2315_v52  ;;  %391 = vmatpush.bf16.xpose.msra.mxu2 %v2317_v13  ;;  %v2326_v51 = vpack.c.bf16 %v329_v14, %v329_v14  ;;  %v2328_v56 = vpack.c.bf16 %v327_v15, %v327_v15  ;;  %v2345_v1 = vpack.c.bf16 %v332_v18, %v332_v18 }
  0x73   :  { %v2333_v20 = vpack.c.bf16 %v333_v48, %v333_v48  ;;  %v337_v21 = vadd.f32 %v1951_v49, %v257_v19  ;;  %v2343_v24 = vpack.c.bf16 %v331_v17, %v331_v17  ;;  %v334_v25 = vadd.f32 %v1952_v23, %v254_v22 }
  0x74   :  { %404 = vmatpush.bf16.xpose.msra.mxu3 %v2326_v51  ;;  %v261_v29 = vmul.f32 %v2286_v57, %v2257_v8  ;;  %v336_v31 = vadd.f32 %v1953_v28, %v256_v59  ;;  %v255_v63 = vmul.f32 %v2286_v57, %v2229_v61  ;;  %v1955_v8 = vld [vmem:[%s2880_s1 + $0x9] ss:$0 sm:$0xff]  ;;  %v338_v38 = vadd.f32 %v1956_v36, %v258_v35 }
  0x75   :  { %v2347_v26 = vpack.c.bf16 %v337_v21, %v337_v21  ;;  %v2349_v27 = vpack.c.bf16 %v334_v25, %v334_v25  ;;  %v260_v61 = vmul.f32 %v2276_v42, %v2252_v6  ;;  %v259_v6 = vmul.f32 %v2286_v57, %v2247_v4 }
  0x76   :  { %v341_v32 = vadd.f32 %v1954_v30, %v261_v29  ;;  %v2369_v33 = vpack.c.bf16 %v336_v31, %v336_v31  ;;  %v335_v37 = vadd.f32 %v1955_v8, %v255_v63  ;;  %v2395_v41 = vpack.c.bf16 %v338_v38, %v338_v38 }
  0x77   :  { %469 = vmatpush.bf16.xpose.msra.mxu0 %v2349_v27  ;;  %v340_v2 = vadd.f32 %v1957_v40, %v260_v61  ;;  %v339_v45 = vadd.f32 %v1958_v44, %v259_v6 }
  0x78   :  { %v2371_v34 = vpack.c.bf16 %v341_v32, %v341_v32  ;;  %v2388_v39 = vpack.c.bf16 %v335_v37, %v335_v37 }
  0x79   :  { %366 = vmatmul.bf16.vlgmr.msra.gmra.mxu1 %v2315_v52  ;;  %392 = vmatmul.bf16.vlgmr.msra.gmra.mxu2 %v2317_v13  ;;  %v2399_v43 = vpack.c.bf16 %v340_v2, %v340_v2  ;;  %v2415_v42 = vpack.c.bf16 %v339_v45, %v339_v45 }
  0x7a   :  { %417 = vmatpush.bf16.xpose.msrb.mxu2 %v2322_v16  ;;  %378 = vmatpush.bf16.xpose.msrb.mxu1 %v2328_v56 }
  0x7b   :  { %405 = vmatmul.bf16.vlgmr.msra.gmra.mxu3 %v2326_v51 }
  0x7c   :  { %456 = vmatpush.bf16.xpose.msrb.mxu3 %v2333_v20 }
  0x7e   :  { %470 = vmatmul.bf16.vlgmr.msra.gmra.mxu0 %v2349_v27 }
  0x7f   :  { %521 = vmatpush.bf16.xpose.msrb.mxu0 %v2395_v41 }
  0x82   :  { %430 = vmatpush.bf16.xpose.msra.mxu1 %v2343_v24  ;;  %443 = vmatpush.bf16.xpose.msra.mxu2 %v2345_v1 }
  0x84   :  { %508 = vmatpush.bf16.xpose.msra.mxu3 %v2347_v26 }
  0x89   :  { %379 = vmatmul.bf16.vlgmr.msrb.gmra.mxu1 %v2328_v56  ;;  %418 = vmatmul.bf16.vlgmr.msrb.gmra.mxu2 %v2322_v16 }
  0x8a   :  { %495 = vmatpush.bf16.xpose.msrb.mxu2 %v2369_v33  ;;  %482 = vmatpush.bf16.xpose.msrb.mxu1 %v2388_v39 }
  0x8b   :  { %457 = vmatmul.bf16.vlgmr.msrb.gmra.mxu3 %v2333_v20 }
  0x8c   :  { %560 = vmatpush.bf16.xpose.msrb.mxu3 %v2371_v34 }
  0x8e   :  { %522 = vmatmul.bf16.vlgmr.msrb.gmra.mxu0 %v2395_v41 }
  0x99   :  { %431 = vmatmul.bf16.vlgmr.msra.gmra.mxu1 %v2343_v24  ;;  %444 = vmatmul.bf16.vlgmr.msra.gmra.mxu2 %v2345_v1 }
  0x9a   :  { %547 = vmatpush.bf16.xpose.msra.mxu2 %v2399_v43  ;;  %534 = vmatpush.bf16.xpose.msra.mxu1 %v2415_v42 }
  0x9b   :  { %509 = vmatmul.bf16.vlgmr.msra.gmra.mxu3 %v2347_v26 }
  0xa9   :  { %496 = vmatmul.bf16.vlgmr.msrb.gmra.mxu2 %v2369_v33  ;;  %483 = vmatmul.bf16.vlgmr.msrb.gmra.mxu1 %v2388_v39 }
  0xab   :  { %561 = vmatmul.bf16.vlgmr.msrb.gmra.mxu3 %v2371_v34 }
  0xb9   :  { %548 = vmatmul.bf16.vlgmr.msra.gmra.mxu2 %v2399_v43  ;;  %535 = vmatmul.bf16.vlgmr.msra.gmra.mxu1 %v2415_v42 }
  0xf6   :  { %v2419_v53 = vpop.f32.mrf.mxu1 }
  0xf7   :  { %v567_v54 = vsel %vm566_vm4, %v2419_v53, -inf }
  0xf8   :  { %568 = vmax.xlane.f32.xlu1 %v567_v54 }
  0xfb   :  { %v2426_v60 = vpop.f32.mrf.mxu0 }
  0xfc   :  { %v393_v55 = vpop.f32.mrf.mxu2  ;;  %v591_v18 = vsel %vm566_vm4, %v2426_v60, -inf }
  0xfd   :  { %v573_v4 = vsel %vm566_vm4, %v393_v55, -inf }
  0xfe   :  { %574 = vmax.xlane.f32.xlu0 %v573_v4  ;;  %v369_v57 = vpop.f32.mrf.mxu1  ;;  %v2424_v58 = vpop.f32.mrf.mxu3 }
  0xff   :  { %v576_v62 = vsel %vm566_vm4, %v2424_v58, -inf }
 0x103   :  { %v473_v5 = vpop.f32.mrf.mxu0 }
 0x104   :  { %v395_v46 = vpop.f32.mrf.mxu2 }
 0x106   :  { %577 = vmax.xlane.f32.xlu0 %v576_v62  ;;  %v2430_v47 = vpop.f32.mrf.mxu1  ;;  %v408_v0 = vpop.f32.mrf.mxu3 }
 0x107   :  { %v570_v3 = vsel %vm566_vm4, %v2430_v47, -inf }
 0x108   :  { %571 = vmax.xlane.f32.xlu1 %v570_v3 }
 0x10b   :  { %v2440_v12 = vpop.f32.mrf.mxu0 }
 0x10c   :  { %v2434_v7 = vpop.f32.mrf.mxu2  ;;  %v603_v37 = vsel %vm566_vm4, %v2440_v12, -inf }
 0x10d   :  { %v579_v50 = vsel %vm566_vm4, %v2434_v7, -inf }
 0x10e   :  { %580 = vmax.xlane.f32.xlu0 %v579_v50  ;;  %v382_v9 = vpop.f32.mrf.mxu1  ;;  %v2438_v10 = vpop.f32.mrf.mxu3 }
 0x10f   :  { %v588_v25 = vsel %vm566_vm4, %v2438_v10, -inf }
 0x113   :  { %v525_v19 = vpop.f32.mrf.mxu0 }
 0x114   :  { %v421_v11 = vpop.f32.mrf.mxu2 }
 0x116   :  { %v2442_v14 = vpop.f32.mrf.mxu1  ;;  %v460_v15 = vpop.f32.mrf.mxu3 }
 0x117   :  { %v582_v49 = vsel %vm566_vm4, %v2442_v14, -inf }
 0x118   :  { %583 = vmax.xlane.f32.xlu1 %v582_v49 }
 0x11c   :  { %v2446_v48 = vpop.f32.mrf.mxu2 }
 0x11d   :  { %v585_v17 = vsel %vm566_vm4, %v2446_v48, -inf }
 0x11e   :  { %586 = vmax.xlane.f32.xlu2 %v585_v17  ;;  %v2452_v21 = vpop.f32.mrf.mxu3  ;;  %v434_v22 = vpop.f32.mrf.mxu1 }
 0x11f   :  { %v600_v23 = vsel %vm566_vm4, %v2452_v21, -inf }
 0x120   :  { %601 = vmax.xlane.f32.xlu0 %v600_v23  ;;  %592 = vmax.xlane.f32.xlu1 %v591_v18 }
 0x124   :  { %v447_v59 = vpop.f32.mrf.mxu2 }
 0x126   :  { %589 = vmax.xlane.f32.xlu2 %v588_v25  ;;  %v512_v28 = vpop.f32.mrf.mxu3  ;;  %v2458_v29 = vpop.f32.mrf.mxu1 }
 0x127   :  { %v594_v35 = vsel %vm566_vm4, %v2458_v29, -inf }
 0x12c   :  { %v2460_v30 = vpop.f32.mrf.mxu2 }
 0x12d   :  { %v597_v31 = vsel %vm566_vm4, %v2460_v30, -inf }
 0x12e   :  { %598 = vmax.xlane.f32.xlu2 %v597_v31  ;;  %v2464_v32 = vpop.f32.mrf.mxu3  ;;  %v486_v63 = vpop.f32.mrf.mxu1 }
 0x12f   :  { %v612_v8 = vsel %vm566_vm4, %v2464_v32, -inf }
 0x130   :  { %613 = vmax.xlane.f32.xlu1 %v612_v8 }
 0x134   :  { %v499_v36 = vpop.f32.mrf.mxu2 }
 0x136   :  { %595 = vmax.xlane.f32.xlu2 %v594_v35  ;;  %v564_v38 = vpop.f32.mrf.mxu3  ;;  %v2476_v6 = vpop.f32.mrf.mxu1 }
 0x138   :  { %604 = vmax.xlane.f32.xlu1 %v603_v37 }
 0x13c   :  { %v2472_v61 = vpop.f32.mrf.mxu2 }
 0x13d   :  { %v609_v40 = vsel %vm566_vm4, %v2472_v61, -inf }
 0x13e   :  { %610 = vmax.xlane.f32.xlu0 %v609_v40  ;;  %v538_v44 = vpop.f32.mrf.mxu1 }
 0x144   :  { %v551_v2 = vpop.f32.mrf.mxu2 }
 0x16b   :  { %v569_v4 = vpop.xlane.xlu1 %568 }
 0x16c   :  { %v615_v5 = vsub.f32 %v2419_v53, %v569_v4 }
 0x171   :  { %v575_v45 = vpop.xlane.xlu0 %574 }
 0x172   :  { %v617_v54 = vsub.f32 %v393_v55, %v575_v45  ;;  %v631_v55 = vmul.f32 1.442695, %v615_v5 }
 0x174   :  { %v635_v57 = vmul.f32 1.442695, %v617_v54 }
 0x176   :  { %1967 = vpow2.f32 %v635_v57 }
 0x179   :  { %v578_v62 = vpop.xlane.xlu0 %577 }
 0x17a   :  { %v618_v46 = vsub.f32 %v2424_v58, %v578_v62  ;;  %v606_v58 = vsel %vm566_vm4, %v2476_v6, -inf }
 0x17b   :  { %v572_v0 = vpop.xlane.xlu1 %571 }
 0x17c   :  { %v2479_v3 = vpop.eup %1967  ;;  %v637_v50 = vmul.f32 1.442695, %v618_v46  ;;  %v616_v9 = vsub.f32 %v2430_v47, %v572_v0 }
 0x17d   :  { %v669_v11 = vsel %vm566_vm4, %v2479_v3, 0.0 }
 0x17e   :  { %1969 = vpow2.f32 %v637_v50  ;;  %v633_v15 = vmul.f32 1.442695, %v616_v9  ;;  %670 = vadd.xlane.f32.xlu2 %v669_v11 }
 0x180   :  { %1971 = vpow2.f32 %v633_v15 }
 0x181   :  { %v581_v49 = vpop.xlane.xlu0 %580  ;;  %1973 = vpow2.f32 %v631_v55 }
 0x182   :  { %v619_v17 = vsub.f32 %v2434_v7, %v581_v49 }
 0x184   :  { %v2488_v18 = vpop.eup %1969  ;;  %v639_v53 = vmul.f32 1.442695, %v619_v17 }
 0x185   :  { %v672_v47 = vsel %vm566_vm4, %v2488_v18, 0.0 }
 0x186   :  { %v2492_v19 = vpop.eup %1971  ;;  %1975 = vpow2.f32 %v639_v53  ;;  %673 = vadd.xlane.f32.xlu0 %v672_v47  ;;  %607 = vmax.xlane.f32.xlu2 %v606_v58 }
 0x187   :  { %v666_v22 = vsel %vm566_vm4, %v2492_v19, 0.0  ;;  %v2496_v7 = vpop.eup %1973 }
 0x188   :  { %667 = vadd.xlane.f32.xlu1 %v666_v22  ;;  %v663_v25 = vsel %vm566_vm4, %v2496_v7, 0.0 }
 0x18b   :  { %v584_v59 = vpop.xlane.xlu1 %583 }
 0x18c   :  { %v2498_v23 = vpop.eup %1975  ;;  %v620_v35 = vsub.f32 %v2442_v14, %v584_v59 }
 0x18d   :  { %v675_v28 = vsel %vm566_vm4, %v2498_v23, 0.0 }
 0x18e   :  { %664 = vadd.xlane.f32.xlu0 %v663_v25  ;;  %v641_v40 = vmul.f32 1.442695, %v620_v35 }
 0x190   :  { %676 = vadd.xlane.f32.xlu1 %v675_v28 }
 0x191   :  { %v587_v31 = vpop.xlane.xlu2 %586 }
 0x192   :  { %v621_v63 = vsub.f32 %v2446_v48, %v587_v31 }
 0x193   :  { %v602_v8 = vpop.xlane.xlu0 %601  ;;  %v593_v2 = vpop.xlane.xlu1 %592 }
 0x194   :  { %v643_v36 = vmul.f32 1.442695, %v621_v63  ;;  %v626_v37 = vsub.f32 %v2452_v21, %v602_v8  ;;  %v623_v4 = vsub.f32 %v2426_v60, %v593_v2  ;;  %v1030_v2 = vsel %vm971_vm5, %v2326_v51, 0 }
 0x195   :  { %1039 = vmatpush.bf16.msra.mxu3 %v1030_v2 }
 0x196   :  { %1977 = vpow2.f32 %v643_v36  ;;  %v653_v38 = vmul.f32 1.442695, %v626_v37  ;;  %v647_v62 = vmul.f32 1.442695, %v623_v4  ;;  %v973_v4 = vsel %vm971_vm5, %v2315_v52, 0 }
 0x197   :  { %982 = vmatpush.bf16.msra.mxu0 %v973_v4  ;;  %v1087_v4 = vsel %vm971_vm5, %v2345_v1, 0 }
 0x198   :  { %1979 = vpow2.f32 %v653_v38 }
 0x199   :  { %v590_v44 = vpop.xlane.xlu2 %589  ;;  %1981 = vpow2.f32 %v641_v40  ;;  %v1011_v40 = vsel %vm971_vm5, %v2317_v13, 0 }
 0x19a   :  { %v622_v45 = vsub.f32 %v2438_v10, %v590_v44  ;;  %1020 = vmatpush.bf16.msrb.mxu2 %v1011_v40  ;;  %v992_v44 = vsel %vm971_vm5, %v2328_v56, 0 }
 0x19b   :  { %1001 = vmatpush.bf16.msrb.mxu1 %v992_v44 }
 0x19c   :  { %v2508_v54 = vpop.eup %1977  ;;  %v645_v48 = vmul.f32 1.442695, %v622_v45 }
 0x19d   :  { %v681_v14 = vsel %vm566_vm4, %v2508_v54, 0.0 }
 0x19e   :  { %v2513_v57 = vpop.eup %1979  ;;  %1983 = vpow2.f32 %v645_v48  ;;  %682 = vadd.xlane.f32.xlu2 %v681_v14  ;;  %1096 = vmatpush.bf16.msra.mxu2 %v1087_v4 }
 0x19f   :  { %v696_v21 = vsel %vm566_vm4, %v2513_v57, 0.0  ;;  %v2517_v10 = vpop.eup %1981  ;;  %1985 = vpow2.f32 %v647_v62 }
 0x1a0   :  { %697 = vadd.xlane.f32.xlu1 %v696_v21  ;;  %v678_v15 = vsel %vm566_vm4, %v2517_v10, 0.0 }
 0x1a1   :  { %v599_v46 = vpop.xlane.xlu2 %598 }
 0x1a2   :  { %v625_v0 = vsub.f32 %v2460_v30, %v599_v46 }
 0x1a3   :  { %v614_v5 = vpop.xlane.xlu1 %613 }
 0x1a4   :  { %v2520_v60 = vpop.eup %1983  ;;  %v651_v50 = vmul.f32 1.442695, %v625_v0  ;;  %v630_v9 = vsub.f32 %v2464_v32, %v614_v5 }
 0x1a5   :  { %v684_v11 = vsel %vm566_vm4, %v2520_v60, 0.0  ;;  %v2527_v17 = vpop.eup %1985 }
 0x1a6   :  { %1987 = vpow2.f32 %v651_v50  ;;  %685 = vadd.xlane.f32.xlu0 %v684_v11  ;;  %679 = vadd.xlane.f32.xlu2 %v678_v15  ;;  %v661_v55 = vmul.f32 1.442695, %v630_v9  ;;  %v687_v25 = vsel %vm566_vm4, %v2527_v17, 0.0 }
 0x1a8   :  { %1989 = vpow2.f32 %v661_v55 }
 0x1a9   :  { %v596_v49 = vpop.xlane.xlu2 %595 }
 0x1aa   :  { %v624_v30 = vsub.f32 %v2458_v29, %v596_v49 }
 0x1ab   :  { %v605_v58 = vpop.xlane.xlu1 %604 }
 0x1ac   :  { %v2530_v53 = vpop.eup %1987  ;;  %v649_v32 = vmul.f32 1.442695, %v624_v30  ;;  %v627_v47 = vsub.f32 %v2440_v12, %v605_v58 }
 0x1ad   :  { %v693_v22 = vsel %vm566_vm4, %v2530_v53, 0.0 }
 0x1ae   :  { %1991 = vpow2.f32 %v649_v32  ;;  %694 = vadd.xlane.f32.xlu0 %v693_v22  ;;  %688 = vadd.xlane.f32.xlu2 %v687_v25  ;;  %v655_v59 = vmul.f32 1.442695, %v627_v47  ;;  %v2537_v31 = vpop.eup %1989 }
 0x1af   :  { %v708_v35 = vsel %vm566_vm4, %v2537_v31, 0.0 }
 0x1b0   :  { %1993 = vpow2.f32 %v655_v59 }
 0x1b1   :  { %v611_v28 = vpop.xlane.xlu0 %610 }
 0x1b2   :  { %v629_v29 = vsub.f32 %v2472_v61, %v611_v28 }
 0x1b4   :  { %v2540_v63 = vpop.eup %1991  ;;  %v659_v8 = vmul.f32 1.442695, %v629_v29 }
 0x1b5   :  { %v690_v12 = vsel %vm566_vm4, %v2540_v63, 0.0 }
 0x1b6   :  { %1995 = vpow2.f32 %v659_v8  ;;  %691 = vadd.xlane.f32.xlu0 %v690_v12  ;;  %709 = vadd.xlane.f32.xlu2 %v708_v35  ;;  %v2546_v36 = vpop.eup %1993 }
 0x1b7   :  { %v699_v38 = vsel %vm566_vm4, %v2546_v36, 0.0 }
 0x1bc   :  { %v2548_v37 = vpop.eup %1995 }
 0x1bd   :  { %v705_v61 = vsel %vm566_vm4, %v2548_v37, 0.0 }
 0x1be   :  { %706 = vadd.xlane.f32.xlu1 %v705_v61  ;;  %700 = vadd.xlane.f32.xlu0 %v699_v38 }
 0x1f1   :  { %v671_v45 = vpop.xlane.xlu2 %670 }
 0x1f2   :  { %1997 = vrcp.f32 %v671_v45  ;;  %v752_v0 = vand.u32 2147483648, %v671_v45  ;;  %v750_v56 = vand.u32 2147483647, %v671_v45  ;;  %vm746_vm7 = vweird.f32 %v671_v45 }
 0x1f4   :  { %v753_v11 = vor.u32 1.1754944e-38, %v752_v0  ;;  %vm751_vm9 = vcmp.eq.f32.partialorder %v750_v56, 8.507059e+37 }
 0x1f8   :  { %v1998_v48 = vpop.eup %1997 }
 0x1f9   :  { %v742_v14 = vmul.f32 %v1998_v48, %v671_v45  ;;  %v674_v21 = vpop.xlane.xlu0 %673  ;;  %v608_v62 = vpop.xlane.xlu2 %607  ;;  %vm747_vm6 = vweird.f32 %v1998_v48  ;;  %v1049_v45 = vsel %vm971_vm5, %v2322_v16, 0 }
 0x1fa   :  { %1999 = vrcp.f32 %v674_v21  ;;  %v628_v46 = vsub.f32 %v2476_v6, %v608_v62  ;;  %vm748_vm8 = vmor %vm746_vm7, %vm747_vm6  ;;  %v765_v25 = vand.u32 2147483647, %v674_v21  ;;  %v767_v59 = vand.u32 2147483648, %v674_v21  ;;  %1058 = vmatpush.bf16.msrb.mxu0 %v1049_v45 }
 0x1fb   :  { %v743_v13 = vsub.f32 1.0, %v742_v14  ;;  %v668_v51 = vpop.xlane.xlu1 %667  ;;  %vm761_vm12 = vweird.f32 %v674_v21 }
 0x1fc   :  { %2001 = vrcp.f32 %v668_v51  ;;  %v657_v50 = vmul.f32 1.442695, %v628_v46  ;;  %v735_v12 = vand.u32 2147483647, %v668_v51  ;;  %v737_v35 = vand.u32 2147483648, %v668_v51 }
 0x1fd   :  { %v744_v5 = vmul.f32 %v1998_v48, %v743_v13  ;;  %vm766_vm15 = vcmp.eq.f32.partialorder %v765_v25, 8.507059e+37  ;;  %v768_v44 = vor.u32 1.1754944e-38, %v767_v59  ;;  %vm731_vm0 = vweird.f32 %v668_v51 }
 0x1fe   :  { %2003 = vpow2.f32 %v657_v50  ;;  %vm736_vm2 = vcmp.eq.f32.partialorder %v735_v12, 8.507059e+37  ;;  %v738_v46 = vor.u32 1.1754944e-38, %v737_v35 }
 0x1ff   :  { %v745_v9 = vadd.f32 %v1998_v48, %v744_v5 }
 0x200   :  { %v2000_v52 = vpop.eup %1999 }
 0x201   :  { %v749_v15 = vsel %vm748_vm8, %v1998_v48, %v745_v9  ;;  %v757_v55 = vmul.f32 %v2000_v52, %v674_v21  ;;  %v2563_v49 = vpop.xlane.xlu0 %664  ;;  %vm762_vm10 = vweird.f32 %v2000_v52 }
 0x202   :  { %v2002_v30 = vpop.eup %2001  ;;  %v754_v6 = vsel %vm751_vm9, %v753_v11, %v749_v15  ;;  %2005 = vrcp.f32 %v2563_v49  ;;  %vm763_vm14 = vmor %vm761_vm12, %vm762_vm10  ;;  %v722_v50 = vand.u32 2147483648, %v2563_v49 }
 0x203   :  { %v755_v58 = vmul.f32 %v2479_v3, %v754_v6  ;;  %v758_v32 = vsub.f32 1.0, %v757_v55  ;;  %v727_v47 = vmul.f32 %v2002_v30, %v668_v51  ;;  %v2567_v22 = vpop.xlane.xlu1 %676  ;;  %vm732_vm13 = vweird.f32 %v2002_v30 }
 0x204   :  { %2007 = vrcp.f32 %v2567_v22  ;;  %v2570_v28 = vpop.eup %2003  ;;  %vm733_vm1 = vmor %vm731_vm0, %vm732_vm13  ;;  %v720_v51 = vand.u32 2147483647, %v2563_v49  ;;  %v1068_v6 = vsel %vm971_vm5, %v2343_v24, 0  ;;  %v782_v24 = vand.u32 2147483648, %v2567_v22 }
 0x205   :  { %v759_v29 = vmul.f32 %v2000_v52, %v758_v32  ;;  %v728_v8 = vsub.f32 1.0, %v727_v47  ;;  %v702_v61 = vsel %vm566_vm4, %v2570_v28, 0.0  ;;  %v953_v3 = vpack.c.bf16 %v755_v58, %v755_v58  ;;  %1077 = vmatpush.bf16.msra.mxu1 %v1068_v6 }
 0x206   :  { %703 = vadd.xlane.f32.xlu1 %v702_v61  ;;  %vm716_vm4 = vweird.f32 %v2563_v49  ;;  %v1106_v58 = vsel %vm971_vm5, %v2333_v20, 0  ;;  %vm721_vm7 = vcmp.eq.f32.partialorder %v720_v51, 8.507059e+37  ;;  %vm776_vm9 = vweird.f32 %v2567_v22 }
 0x207   :  { %v760_v38 = vadd.f32 %v2000_v52, %v759_v29  ;;  %v729_v40 = vmul.f32 %v2002_v30, %v728_v8  ;;  %1767 = vmatmul.msk.bf16.vlgmr.msrb.gmra.mxu2 %vm967_vm11, %v953_v3  ;;  %1115 = vmatpush.bf16.msrb.mxu3 %v1106_v58  ;;  %v780_v20 = vand.u32 2147483647, %v2567_v22  ;;  %v1163_v61 = vsel %vm971_vm5, %v2369_v33, 0 }
 0x208   :  { %v2006_v2 = vpop.eup %2005  ;;  %1172 = vmatpush.bf16.msrb.mxu2 %v1163_v61 }
 0x209   :  { %v764_v48 = vsel %vm763_vm14, %v2000_v52, %v760_v38  ;;  %v730_v14 = vadd.f32 %v2002_v30, %v729_v40  ;;  %v712_v21 = vmul.f32 %v2006_v2, %v2563_v49  ;;  %vm717_vm3 = vweird.f32 %v2006_v2 }
 0x20a   :  { %v2008_v62 = vpop.eup %2007  ;;  %v769_v13 = vsel %vm766_vm15, %v768_v44, %v764_v48  ;;  %vm718_vm6 = vmor %vm716_vm4, %vm717_vm3  ;;  %vm781_vm12 = vcmp.eq.f32.partialorder %v780_v20, 8.507059e+37  ;;  %v1201_v20 = vsel %vm971_vm5, %v2395_v41, 0 }
 0x20b   :  { %v770_v0 = vmul.f32 %v2488_v18, %v769_v13  ;;  %v734_v5 = vsel %vm733_vm1, %v2002_v30, %v730_v14  ;;  %v713_v16 = vsub.f32 1.0, %v712_v21  ;;  %v772_v56 = vmul.f32 %v2008_v62, %v2567_v22 }
 0x20c   :  { %v739_v1 = vsel %vm736_vm2, %v738_v46, %v734_v5  ;;  %v723_v30 = vor.u32 1.1754944e-38, %v722_v50  ;;  %vm777_vm8 = vweird.f32 %v2008_v62  ;;  %v1182_v5 = vsel %vm971_vm5, %v2347_v26, 0 }
 0x20d   :  { %v740_v9 = vmul.f32 %v2492_v19, %v739_v1  ;;  %v714_v52 = vmul.f32 %v2006_v2, %v713_v16  ;;  %v773_v11 = vsub.f32 1.0, %v772_v56  ;;  %v954_v15 = vpack.c.bf16 %v770_v0, %v770_v0  ;;  %vm2600_vm10 = vmor %vm776_vm9, %vm777_vm8 }
 0x20e   :  { %v1144_v0 = vsel %vm971_vm5, %v2388_v39, 0 }
 0x20f   :  { %v715_v55 = vadd.f32 %v2006_v2, %v714_v52  ;;  %1768 = vmatmul.msk.bf16.vlgmr.msra.gmra.mxu3 %vm967_vm11, %v954_v15  ;;  %v952_v18 = vpack.c.bf16 %v740_v9, %v740_v9  ;;  %v774_v19 = vmul.f32 %v2008_v62, %v773_v11 }
 0x210   :  { %1191 = vmatpush.bf16.msra.mxu3 %v1182_v5 }
 0x211   :  { %v719_v32 = vsel %vm718_vm6, %v2006_v2, %v715_v55  ;;  %1766 = vmatmul.msk.bf16.vlgmr.msrb.gmra.mxu1 %vm967_vm11, %v952_v18  ;;  %v683_v47 = vpop.xlane.xlu2 %682  ;;  %v775_v29 = vadd.f32 %v2008_v62, %v774_v19  ;;  %v783_v2 = vor.u32 1.1754944e-38, %v782_v24 }
 0x212   :  { %v724_v25 = vsel %vm721_vm7, %v723_v30, %v719_v32  ;;  %2009 = vrcp.f32 %v683_v47  ;;  %v812_v45 = vand.u32 2147483648, %v683_v47  ;;  %v810_v48 = vand.u32 2147483647, %v683_v47  ;;  %1153 = vmatpush.bf16.msrb.mxu1 %v1144_v0 }
 0x213   :  { %v725_v49 = vmul.f32 %v2496_v7, %v724_v25  ;;  %v2594_v59 = vpop.xlane.xlu1 %697  ;;  %v1125_v7 = vsel %vm971_vm5, %v2349_v27, 0  ;;  %v779_v3 = vsel %vm2600_vm10, %v2008_v62, %v775_v29  ;;  %vm806_vm14 = vweird.f32 %v683_v47 }
 0x214   :  { %2011 = vrcp.f32 %v2594_v59  ;;  %v784_v27 = vsel %vm781_vm12, %v783_v2, %v779_v3  ;;  %v813_v13 = vor.u32 1.1754944e-38, %v812_v45  ;;  %vm811_vm0 = vcmp.eq.f32.partialorder %v810_v48, 8.507059e+37 }
 0x215   :  { %v951_v8 = vpack.c.bf16 %v725_v49, %v725_v49  ;;  %v785_v14 = vmul.f32 %v2498_v23, %v784_v27  ;;  %v885_v9 = vand.u32 2147483647, %v2594_v59  ;;  %v887_v39 = vand.u32 2147483648, %v2594_v59 }
 0x216   :  { %vm881_vm2 = vweird.f32 %v2594_v59 }
 0x217   :  { %1765 = vmatmul.msk.bf16.vlgmr.msra.gmra.mxu0 %vm967_vm11, %v951_v8  ;;  %v955_v6 = vpack.c.bf16 %v785_v14, %v785_v14 }
 0x218   :  { %v2010_v12 = vpop.eup %2009  ;;  %1134 = vmatpush.bf16.msra.mxu0 %v1125_v7 }
 0x219   :  { %v802_v38 = vmul.f32 %v2010_v12, %v683_v47  ;;  %v2611_v22 = vpop.xlane.xlu0 %685  ;;  %v2613_v40 = vpop.xlane.xlu2 %679  ;;  %vm807_vm13 = vweird.f32 %v2010_v12 }
 0x21a   :  { %2013 = vrcp.f32 %v2611_v22  ;;  %v2617_v33 = vpop.eup %2011  ;;  %vm808_vm15 = vmor %vm806_vm14, %vm807_vm13  ;;  %v827_v15 = vand.u32 2147483648, %v2611_v22  ;;  %v825_v18 = vand.u32 2147483647, %v2611_v22  ;;  %v797_v32 = vand.u32 2147483648, %v2613_v40 }
 0x21b   :  { %v803_v44 = vsub.f32 1.0, %v802_v38  ;;  %2015 = vrcp.f32 %v2613_v40  ;;  %v877_v46 = vmul.f32 %v2617_v33, %v2594_v59  ;;  %vm821_vm3 = vweird.f32 %v2611_v22 }
 0x21c   :  { %v795_v19 = vand.u32 2147483647, %v2613_v40  ;;  %v828_v25 = vor.u32 1.1754944e-38, %v827_v15  ;;  %vm791_vm6 = vweird.f32 %v2613_v40  ;;  %vm826_vm8 = vcmp.eq.f32.partialorder %v825_v18, 8.507059e+37 }
 0x21d   :  { %v804_v4 = vmul.f32 %v2010_v12, %v803_v44  ;;  %v878_v55 = vsub.f32 1.0, %v877_v46  ;;  %v798_v61 = vor.u32 1.1754944e-38, %v797_v32  ;;  %vm882_vm12 = vweird.f32 %v2617_v33 }
 0x21e   :  { %vm796_vm10 = vcmp.eq.f32.partialorder %v795_v19, 8.507059e+37 }
 0x21f   :  { %v805_v21 = vadd.f32 %v2010_v12, %v804_v4  ;;  %v879_v24 = vmul.f32 %v2617_v33, %v878_v55 }
 0x220   :  { %v2014_v62 = vpop.eup %2013 }
 0x221   :  { %v2016_v16 = vpop.eup %2015  ;;  %v809_v56 = vsel %vm808_vm15, %v2010_v12, %v805_v21  ;;  %v817_v1 = vmul.f32 %v2014_v62, %v2611_v22  ;;  %v2627_v23 = vpop.xlane.xlu0 %694  ;;  %vm822_vm1 = vweird.f32 %v2014_v62  ;;  %v1239_v12 = vsel %vm971_vm5, %v2399_v43, 0  ;;  %vm2679_vm15 = vmor %vm881_vm2, %vm882_vm12 }
 0x222   :  { %v2629_v51 = vpop.xlane.xlu2 %688  ;;  %v814_v50 = vsel %vm811_vm0, %v813_v13, %v809_v56  ;;  %v787_v52 = vmul.f32 %v2016_v16, %v2613_v40  ;;  %2017 = vrcp.f32 %v2627_v23  ;;  %vm792_vm4 = vweird.f32 %v2016_v16  ;;  %vm823_vm7 = vmor %vm821_vm3, %vm822_vm1 }
 0x223   :  { %v815_v26 = vmul.f32 %v2508_v54, %v814_v50  ;;  %v818_v11 = vsub.f32 1.0, %v817_v1  ;;  %2019 = vrcp.f32 %v2629_v51  ;;  %vm2651_vm9 = vmor %vm791_vm6, %vm792_vm4  ;;  %v880_v45 = vadd.f32 %v2617_v33, %v879_v24 }
 0x224   :  { %v788_v30 = vsub.f32 1.0, %v787_v52  ;;  %v872_v48 = vand.u32 2147483648, %v2627_v23  ;;  %vm866_vm14 = vweird.f32 %v2627_v23  ;;  %v842_v46 = vand.u32 2147483648, %v2629_v51 }
 0x225   :  { %v819_v58 = vmul.f32 %v2014_v62, %v818_v11  ;;  %v957_v49 = vpack.c.bf16 %v815_v26, %v815_v26  ;;  %v1258_v56 = vsel %vm971_vm5, %v2371_v34, 0  ;;  %v884_v26 = vsel %vm2679_vm15, %v2617_v33, %v880_v45 }
 0x226   :  { %v789_v54 = vmul.f32 %v2016_v16, %v788_v30  ;;  %v873_v50 = vor.u32 1.1754944e-38, %v872_v48  ;;  %vm836_vm3 = vweird.f32 %v2629_v51 }
 0x227   :  { %v820_v47 = vadd.f32 %v2014_v62, %v819_v58  ;;  %1769 = vmatmul.msk.bf16.vlgmr.msrb.gmra.mxu0 %vm967_vm11, %v955_v6  ;;  %1771 = vmatmul.msk.bf16.vlgmr.msra.gmra.mxu2 %vm967_vm11, %v957_v49  ;;  %v843_v6 = vor.u32 1.1754944e-38, %v842_v46 }
 0x228   :  { %v2018_v29 = vpop.eup %2017  ;;  %v790_v8 = vadd.f32 %v2016_v16, %v789_v54  ;;  %1210 = vmatpush.bf16.msrb.mxu0 %v1201_v20  ;;  %1248 = vmatpush.bf16.msra.mxu2 %v1239_v12 }
 0x229   :  { %v824_v35 = vsel %vm823_vm7, %v2014_v62, %v820_v47  ;;  %v862_v3 = vmul.f32 %v2018_v29, %v2627_v23  ;;  %v2657_v38 = vpop.xlane.xlu0 %691  ;;  %v2020_v40 = vpop.eup %2019  ;;  %vm867_vm13 = vweird.f32 %v2018_v29  ;;  %v870_v62 = vand.u32 2147483647, %v2627_v23 }
 0x22a   :  { %v829_v22 = vsel %vm826_vm8, %v828_v25, %v824_v35  ;;  %v794_v41 = vsel %vm2651_vm9, %v2016_v16, %v790_v8  ;;  %2021 = vrcp.f32 %v2657_v38  ;;  %v2662_v43 = vpop.xlane.xlu2 %709  ;;  %v832_v14 = vmul.f32 %v2020_v40, %v2629_v51  ;;  %vm868_vm0 = vmor %vm866_vm14, %vm867_vm13 }
 0x22b   :  { %v830_v2 = vmul.f32 %v2520_v60, %v829_v22  ;;  %v799_v44 = vsel %vm796_vm10, %v798_v61, %v794_v41  ;;  %v863_v27 = vsub.f32 1.0, %v862_v3  ;;  %2023 = vrcp.f32 %v2662_v43 }
 0x22c   :  { %v800_v4 = vmul.f32 %v2517_v10, %v799_v44  ;;  %v833_v13 = vsub.f32 1.0, %v832_v14  ;;  %v840_v60 = vand.u32 2147483647, %v2629_v51  ;;  %v888_v23 = vor.u32 1.1754944e-38, %v887_v39 }
 0x22d   :  { %v864_v21 = vmul.f32 %v2018_v29, %v863_v27  ;;  %v958_v16 = vpack.c.bf16 %v830_v2, %v830_v2  ;;  %vm837_vm1 = vweird.f32 %v2020_v40  ;;  %vm871_vm2 = vcmp.eq.f32.partialorder %v870_v62, 8.507059e+37 }
 0x22e   :  { %v956_v5 = vpack.c.bf16 %v800_v4, %v800_v4  ;;  %v834_v52 = vmul.f32 %v2020_v40, %v833_v13  ;;  %vm838_vm4 = vmor %vm836_vm3, %vm837_vm1  ;;  %vm841_vm6 = vcmp.eq.f32.partialorder %v840_v60, 8.507059e+37  ;;  %v857_v54 = vand.u32 2147483648, %v2657_v38 }
 0x22f   :  { %v865_v0 = vadd.f32 %v2018_v29, %v864_v21  ;;  %1772 = vmatmul.msk.bf16.vlgmr.msrb.gmra.mxu3 %vm967_vm11, %v958_v16  ;;  %v855_v25 = vand.u32 2147483647, %v2657_v38  ;;  %vm886_vm8 = vcmp.eq.f32.partialorder %v885_v9, 8.507059e+37  ;;  %vm851_vm9 = vweird.f32 %v2657_v38 }
 0x230   :  { %v2022_v1 = vpop.eup %2021  ;;  %1770 = vmatmul.msk.bf16.vlgmr.msra.gmra.mxu1 %vm967_vm11, %v956_v5  ;;  %v835_v18 = vadd.f32 %v2020_v40, %v834_v52  ;;  %1267 = vmatpush.bf16.msrb.mxu3 %v1258_v56  ;;  %v889_v49 = vsel %vm886_vm8, %v888_v23, %v884_v26  ;;  %v858_v20 = vor.u32 1.1754944e-38, %v857_v54  ;;  %v947_v46 = vand.u32 2147483648, %v2662_v43 }
 0x231   :  { %v869_v11 = vsel %vm868_vm0, %v2018_v29, %v865_v0  ;;  %v847_v15 = vmul.f32 %v2022_v1, %v2657_v38  ;;  %v707_v34 = vpop.xlane.xlu1 %706  ;;  %v2693_v55 = vpop.xlane.xlu0 %700  ;;  %vm852_vm7 = vweird.f32 %v2022_v1  ;;  %vm856_vm12 = vcmp.eq.f32.partialorder %v855_v25, 8.507059e+37 }
 0x232   :  { %v874_v39 = vsel %vm871_vm2, %v873_v50, %v869_v11  ;;  %2025 = vrcp.f32 %v707_v34  ;;  %v2696_v30 = vpop.eup %2023  ;;  %v839_v32 = vsel %vm838_vm4, %v2020_v40, %v835_v18  ;;  %vm853_vm10 = vmor %vm851_vm9, %vm852_vm7  ;;  %v890_v59 = vmul.f32 %v2513_v57, %v889_v49  ;;  %v1912_v18 = vld [vmem:[%s2881_s2 + $0x18] sm:$0xff] }
 0x233   :  { %v875_v33 = vmul.f32 %v2530_v53, %v874_v39  ;;  %v848_v58 = vsub.f32 1.0, %v847_v15  ;;  %v937_v19 = vmul.f32 %v2696_v30, %v2662_v43  ;;  %2027 = vrcp.f32 %v2693_v55  ;;  %v1913_v39 = vld [vmem:[%s2881_s2 + $0x20] sm:$0xff] }
 0x234   :  { %v844_v51 = vsel %vm841_vm6, %v843_v6, %v839_v32  ;;  %v930_v40 = vand.u32 2147483647, %v707_v34  ;;  %v932_v2 = vand.u32 2147483648, %v707_v34  ;;  %vm926_vm14 = vweird.f32 %v707_v34  ;;  %v1909_v6 = vld [vmem:[%s2881_s2] sm:$0xff] }
 0x235   :  { %v849_v47 = vmul.f32 %v2022_v1, %v848_v58  ;;  %v845_v53 = vmul.f32 %v2527_v17, %v844_v51  ;;  %v961_v24 = vpack.c.bf16 %v875_v33, %v875_v33  ;;  %v938_v12 = vsub.f32 1.0, %v937_v19 }
 0x236   :  { %v902_v4 = vand.u32 2147483648, %v2693_v55  ;;  %v962_v57 = vpack.c.bf16 %v890_v59, %v890_v59  ;;  %vm942_vm0 = vweird.f32 %v2696_v30  ;;  %vm931_vm2 = vcmp.eq.f32.partialorder %v930_v40, 8.507059e+37 }
 0x237   :  { %v850_v29 = vadd.f32 %v2022_v1, %v849_v47  ;;  %v959_v35 = vpack.c.bf16 %v845_v53, %v845_v53  ;;  %1775 = vmatmul.msk.bf16.vlgmr.msrb.gmra.mxu2 %vm967_vm11, %v961_v24  ;;  %v939_v41 = vmul.f32 %v2696_v30, %v938_v12  ;;  %v933_v21 = vor.u32 1.1754944e-38, %v932_v2 }
 0x238   :  { %v2026_v8 = vpop.eup %2025  ;;  %vm896_vm3 = vweird.f32 %v2693_v55  ;;  %vm941_vm4 = vweird.f32 %v2662_v43  ;;  %v903_v0 = vor.u32 1.1754944e-38, %v902_v4  ;;  %v945_v5 = vand.u32 2147483647, %v2662_v43 }
 0x239   :  { %v854_v7 = vsel %vm853_vm10, %v2022_v1, %v850_v29  ;;  %v922_v61 = vmul.f32 %v2026_v8, %v707_v34  ;;  %v2028_v3 = vpop.eup %2027  ;;  %1773 = vmatmul.msk.bf16.vlgmr.msra.gmra.mxu0 %vm967_vm11, %v959_v35  ;;  %vm927_vm13 = vweird.f32 %v2026_v8  ;;  %v940_v62 = vadd.f32 %v2696_v30, %v939_v41  ;;  %vm943_vm8 = vmor %vm941_vm4, %vm942_vm0  ;;  %v1916_v34 = vld [vmem:[%s2881_s2 + $0x38] sm:$0xff] }
 0x23a   :  { %v859_v9 = vsel %vm856_vm12, %v858_v20, %v854_v7  ;;  %v892_v22 = vmul.f32 %v2028_v3, %v2693_v55  ;;  %vm897_vm15 = vweird.f32 %v2028_v3  ;;  %vm928_vm1 = vmor %vm926_vm14, %vm927_vm13  ;;  %v948_v26 = vor.u32 1.1754944e-38, %v947_v46  ;;  %1400 = vmatpush.bf16.msra.mxu0 %v1916_v34 }
 0x23b   :  { %v860_v17 = vmul.f32 %v2540_v63, %v859_v9  ;;  %v923_v38 = vsub.f32 1.0, %v922_v61  ;;  %v900_v63 = vand.u32 2147483647, %v2693_v55  ;;  %vm898_vm6 = vmor %vm896_vm3, %vm897_vm15  ;;  %v944_v23 = vsel %vm943_vm8, %v2696_v30, %v940_v62  ;;  %v1914_v55 = vld [vmem:[%s2881_s2 + $0x28] sm:$0xff]  ;;  %v1911_v30 = vld [vmem:[%s2881_s2 + $0x10] sm:$0xff] }
 0x23c   :  { %v893_v27 = vsub.f32 1.0, %v892_v22  ;;  %vm946_vm9 = vcmp.eq.f32.partialorder %v945_v5, 8.507059e+37 }
 0x23d   :  { %v924_v44 = vmul.f32 %v2026_v8, %v923_v38  ;;  %v960_v45 = vpack.c.bf16 %v860_v17, %v860_v17  ;;  %vm901_vm7 = vcmp.eq.f32.partialorder %v900_v63, 8.507059e+37  ;;  %v949_v15 = vsel %vm946_vm9, %v948_v26, %v944_v23 }
 0x23e   :  { %v894_v14 = vmul.f32 %v2028_v3, %v893_v27 }
 0x23f   :  { %v925_v48 = vadd.f32 %v2026_v8, %v924_v44  ;;  %1776 = vmatmul.msk.bf16.vlgmr.msra.gmra.mxu3 %vm967_vm11, %v962_v57 }
 0x240   :  { %v895_v60 = vadd.f32 %v2028_v3, %v894_v14  ;;  %1774 = vmatmul.msk.bf16.vlgmr.msrb.gmra.mxu1 %vm967_vm11, %v960_v45 }
 0x241   :  { %v929_v13 = vsel %vm928_vm1, %v2026_v8, %v925_v48 }
 0x242   :  { %v934_v10 = vsel %vm931_vm2, %v933_v21, %v929_v13  ;;  %v899_v56 = vsel %vm898_vm6, %v2028_v3, %v895_v60 }
 0x243   :  { %v935_v16 = vmul.f32 %v2548_v37, %v934_v10  ;;  %v904_v1 = vsel %vm901_vm7, %v903_v0, %v899_v56  ;;  %v950_v37 = vmul.f32 %v2537_v31, %v949_v15  ;;  %v1220_v31 = vsel %vm971_vm5, %v2415_v42, 0  ;;  %v1910_v42 = vld [vmem:[%s2881_s2 + $0x8] sm:$0xff] }
 0x244   :  { %v905_v50 = vmul.f32 %v2546_v36, %v904_v1  ;;  %v1915_v36 = vld [vmem:[%s2881_s2 + $0x30] sm:$0xff]  ;;  %1229 = vmatpush.bf16.msra.mxu1 %v1220_v31  ;;  %v2766_v31 = vld [vmem:[%s2882_s3] ss:$0 sm:$0xff] }
 0x245   :  { %v965_v52 = vpack.c.bf16 %v935_v16, %v935_v16  ;;  %v966_v43 = vpack.c.bf16 %v950_v37, %v950_v37  ;;  %1401 = vmatpush.bf16.msra.mxu0 %v1915_v36 }
 0x246   :  { %v963_v11 = vpack.c.bf16 %v905_v50, %v905_v50 }
 0x247   :  { %1779 = vmatmul.msk.bf16.vlgmr.msra.gmra.mxu2 %vm967_vm11, %v965_v52 }
 0x249   :  { %1777 = vmatmul.msk.bf16.vlgmr.msrb.gmra.mxu0 %vm967_vm11, %v963_v11 }
 0x24a   :  { %1402 = vmatpush.bf16.msra.mxu0 %v1914_v55 }
 0x24e   :  { %1403 = vmatpush.bf16.msra.mxu0 %v1913_v39 }
 0x24f   :  { %1780 = vmatmul.msk.bf16.vlgmr.msrb.gmra.mxu3 %vm967_vm11, %v966_v43 }
 0x252   :  { %1404 = vmatpush.bf16.msra.mxu0 %v1912_v18 }
 0x256   :  { %1405 = vmatpush.bf16.msra.mxu0 %v1911_v30 }
 0x25a   :  { %1406 = vmatpush.bf16.msra.mxu0 %v1910_v42  ;;  %v2034_v42 = vmov 8.0  }
 0x25e   :  { %1407 = vmatpush.bf16.msra.mxu0 %v1909_v6 }
 0x279   :  { %v704_v33 = vpop.xlane.xlu1 %703 }
 0x27a   :  { %2029 = vrcp.f32 %v704_v33  ;;  %v917_v19 = vand.u32 2147483648, %v704_v33  ;;  %v915_v47 = vand.u32 2147483647, %v704_v33  ;;  %vm911_vm10 = vweird.f32 %v704_v33 }
 0x27b   :  { %2031 = vrcp.f32 %v2034_v42 }
 0x27c   :  { %v918_v53 = vor.u32 1.1754944e-38, %v917_v19  ;;  %vm916_vm13 = vcmp.eq.f32.partialorder %v915_v47, 8.507059e+37 }
 0x280   :  { %v2030_v58 = vpop.eup %2029 }
 0x281   :  { %v907_v32 = vmul.f32 %v2030_v58, %v704_v33  ;;  %vm912_vm5 = vweird.f32 %v2030_v58 }
 0x282   :  { %vm913_vm12 = vmor %vm911_vm10, %vm912_vm5 }
 0x283   :  { %v908_v54 = vsub.f32 1.0, %v907_v32  ;;  %v2032_v32 = vpop.eup %2031 }
 0x284   :  { %vm1497_vm14 = vweird.f32 %v2032_v32 }
 0x285   :  { %v909_v51 = vmul.f32 %v2030_v58, %v908_v54 }
 0x287   :  { %v910_v25 = vadd.f32 %v2030_v58, %v909_v51 }
 0x289   :  { %v914_v49 = vsel %vm913_vm12, %v2030_v58, %v910_v25  ;;  %v1493_v25 = vmul.f32 8.0, %v2032_v32 }
 0x28a   :  { %v919_v29 = vsel %vm916_vm13, %v918_v53, %v914_v49  ;;  %v1022_v24 = vpop.f32.mrf.mxu2  ;;  %v1924_v53 = vld [vmem:[%s2884_s4 + $0x38] sm:$0xff] }
 0x28b   :  { %v920_v8 = vmul.f32 %v2570_v28, %v919_v29  ;;  %1293 = vst [vmem:[#allocation1 + $0x10] ss:$2 sm:$0xff] %v1022_v24  ;;  %1577 = vmatpush.bf16.msrb.mxu1 %v1924_v53  ;;  %v1928_v53 = vld [vmem:[%s2885_s6 + $0x18] sm:$0xff] }
 0x28d   :  { %v964_v20 = vpack.c.bf16 %v920_v8, %v920_v8 }
 0x28e   :  { %v1003_v12 = vpop.f32.mrf.mxu1 }
 0x28f   :  { %1291 = vst [vmem:[#allocation1 + $0x1] ss:$2 sm:$0xff] %v1003_v12  ;;  %1778 = vmatmul.msk.bf16.vlgmr.msra.gmra.mxu1 %vm967_vm11, %v964_v20  ;;  %vm1461_vm11 = vcmask 1043456  }
 0x292   :  { %v1041_v35 = vpop.f32.mrf.mxu3  ;;  %v1024_v7 = vpop.f32.mrf.mxu2 }
 0x293   :  { %1295 = vst [vmem:[#allocation1 + $0x11] ss:$2 sm:$0xff] %v1041_v35  ;;  %v1494_v35 = vsub.f32 1.0, %v1493_v25 }
 0x294   :  { %v984_v61 = vpop.f32.mrf.mxu0 }
 0x295   :  { %1289 = vst [vmem:[#allocation1] ss:$2 sm:$0xff] %v984_v61 }
 0x296   :  { %v1005_v3 = vpop.f32.mrf.mxu1 }
 0x29a   :  { %v1043_v59 = vpop.f32.mrf.mxu3  ;;  %v1305_v38 = vld.sshfl [vmem:[#allocation1 + $0x10] sm:$0xff pattern:$0x75316420] }
 0x29b   :  { %v1495_v59 = vmul.f32 %v2032_v32, %v1494_v35 }
 0x29c   :  { %v986_v9 = vpop.f32.mrf.mxu0  ;;  %v1304_v17 = vld.sshfl [vmem:[#allocation1] sm:$0xff pattern:$0x75316420] }
 0x29d   :  { %v1328_v22 = vpack.c.bf16 %v1305_v38, %v1304_v17 }
 0x29f   :  { %1408 = vmatmul.bf16.vlgmr.msra.gmra.mxu0 %v1328_v22 }
 0x2a4   :  { %v1060_v41 = vpop.f32.mrf.mxu0 }
 0x2a5   :  { %1297 = vst [vmem:[#allocation1 + $0x20] ss:$2 sm:$0xff] %v1060_v41 }
 0x2aa   :  { %v1098_v28 = vpop.f32.mrf.mxu2 }
 0x2ab   :  { %1301 = vst [vmem:[#allocation1 + $0x30] ss:$2 sm:$0xff] %v1098_v28  ;;  %v1496_v28 = vadd.f32 %v2032_v32, %v1495_v59  ;;  %v1940_v59 = vld [vmem:[%s2887_s8 + $0x38] sm:$0xff] }
 0x2ac   :  { %v1062_v40 = vpop.f32.mrf.mxu0  ;;  %1743 = vmatpush.bf16.msra.mxu3 %v1940_v59 }
 0x2ad   :  { %v1079_v2 = vpop.f32.mrf.mxu1 }
 0x2ae   :  { %1299 = vst [vmem:[#allocation1 + $0x21] ss:$2 sm:$0xff] %v1079_v2 }
 0x2b2   :  { %v1100_v44 = vpop.f32.mrf.mxu2  ;;  %v1117_v27 = vpop.f32.mrf.mxu3 }
 0x2b3   :  { %1303 = vst [vmem:[#allocation1 + $0x31] ss:$2 sm:$0xff] %v1117_v27 }
 0x2b5   :  { %v1081_v45 = vpop.f32.mrf.mxu1  ;;  %v1306_v14 = vld.sshfl [vmem:[#allocation1 + $0x20] sm:$0xff pattern:$0x75316420] }
 0x2b6   :  { %v1136_v4 = vpop.f32.mrf.mxu0 }
 0x2b7   :  { %1308 = vst [vmem:[#allocation1] ss:$2 sm:$0xff] %v1136_v4  ;;  %v1498_v4 = vsel %vm1497_vm14, %v2032_v32, %v1496_v28  ;;  %v1960_v28 = vld [vmem:[%s2883_s5] ss:$0 sm:$0xff] }
 0x2ba   :  { %v1119_v57 = vpop.f32.mrf.mxu3  ;;  %v1174_v48 = vpop.f32.mrf.mxu2  ;;  %v1307_v63 = vld.sshfl [vmem:[#allocation1 + $0x30] sm:$0xff pattern:$0x75316420] }
 0x2bb   :  { %1310 = vst [vmem:[#allocation1 + $0x10] ss:$2 sm:$0xff] %v1174_v48  ;;  %v1329_v21 = vpack.c.bf16 %v1307_v63, %v1306_v14  ;;  %v1923_v14 = vld [vmem:[%s2884_s4 + $0x30] sm:$0xff]  ;;  %v1922_v63 = vld [vmem:[%s2884_s4 + $0x28] sm:$0xff] }
 0x2bc   :  { %1578 = vmatpush.bf16.msrb.mxu1 %v1923_v14 }
 0x2bd   :  { %v1155_v62 = vpop.f32.mrf.mxu1  ;;  %1413 = vmatmul.bf16.gmra.mxu0 %v1329_v21 }
 0x2be   :  { %v1138_v13 = vpop.f32.mrf.mxu0  ;;  %1309 = vst [vmem:[#allocation1 + $0x1] ss:$2 sm:$0xff] %v1155_v62  ;;  %v1921_v62 = vld [vmem:[%s2884_s4 + $0x20] sm:$0xff] }
 0x2c0   :  { %1579 = vmatpush.bf16.msrb.mxu1 %v1922_v63 }
 0x2c2   :  { %v1176_v60 = vpop.f32.mrf.mxu2  ;;  %v1193_v46 = vpop.f32.mrf.mxu3 }
 0x2c3   :  { %1311 = vst [vmem:[#allocation1 + $0x11] ss:$2 sm:$0xff] %v1193_v46  ;;  %v1920_v60 = vld [vmem:[%s2884_s4 + $0x18] sm:$0xff] }
 0x2c4   :  { %1580 = vmatpush.bf16.msrb.mxu1 %v1921_v62 }
 0x2c5   :  { %v1157_v10 = vpop.f32.mrf.mxu1  ;;  %v1316_v56 = vld.sshfl [vmem:[#allocation1] sm:$0xff pattern:$0x75316420] }
 0x2c6   :  { %v1212_v0 = vpop.f32.mrf.mxu0  ;;  %v1919_v10 = vld [vmem:[%s2884_s4 + $0x10] sm:$0xff] }
 0x2c7   :  { %1312 = vst [vmem:[#allocation1 + $0x20] ss:$2 sm:$0xff] %v1212_v0 }
 0x2c8   :  { %1581 = vmatpush.bf16.msrb.mxu1 %v1920_v60  ;;  %v1962_v60 = vld [vmem:[%s2888_s9] ss:$0 sm:$0xff] }
 0x2ca   :  { %v1195_v5 = vpop.f32.mrf.mxu3  ;;  %v1250_v16 = vpop.f32.mrf.mxu2  ;;  %v1317_v1 = vld.sshfl [vmem:[#allocation1 + $0x10] sm:$0xff pattern:$0x75316420] }
 0x2cb   :  { %1314 = vst [vmem:[#allocation1 + $0x30] ss:$2 sm:$0xff] %v1250_v16  ;;  %v1330_v23 = vpack.c.bf16 %v1317_v1, %v1316_v56  ;;  %v1918_v16 = vld [vmem:[%s2884_s4 + $0x8] sm:$0xff] }
 0x2cc   :  { %1582 = vmatpush.bf16.msrb.mxu1 %v1919_v10 }
 0x2cd   :  { %1418 = vmatmul.bf16.gmra.mxu0 %v1330_v23  ;;  %v1917_v23 = vld [vmem:[%s2884_s4] sm:$0xff] }
 0x2ce   :  { %v1214_v50 = vpop.f32.mrf.mxu0 }
 0x2d0   :  { %1583 = vmatpush.bf16.msrb.mxu1 %v1918_v16 }
 0x2d2   :  { %v1252_v52 = vpop.f32.mrf.mxu2  ;;  %v1269_v26 = vpop.f32.mrf.mxu3 }
 0x2d3   :  { %1315 = vst [vmem:[#allocation1 + $0x31] ss:$2 sm:$0xff] %v1269_v26  ;;  %v1932_v52 = vld [vmem:[%s2885_s6 + $0x38] sm:$0xff] }
 0x2d4   :  { %1584 = vmatpush.bf16.msrb.mxu1 %v1917_v23  ;;  %1660 = vmatpush.bf16.msrb.mxu2 %v1932_v52 }
 0x2da   :  { %v1271_v11 = vpop.f32.mrf.mxu3  ;;  %v1319_v34 = vld.sshfl [vmem:[#allocation1 + $0x30] sm:$0xff pattern:$0x75316420] }
 0x30c   :  { %v1231_v15 = vpop.f32.mrf.mxu1 }
 0x30d   :  { %1313 = vst [vmem:[#allocation1 + $0x21] ss:$2 sm:$0xff] %v1231_v15 }
 0x314   :  { %v1233_v37 = vpop.f32.mrf.mxu1  ;;  %v1318_v43 = vld.sshfl [vmem:[#allocation1 + $0x20] sm:$0xff pattern:$0x75316420] }
 0x315   :  { %v1331_v36 = vpack.c.bf16 %v1319_v34, %v1318_v43  ;;  %v1931_v34 = vld [vmem:[%s2885_s6 + $0x30] sm:$0xff] }
 0x316   :  { %1661 = vmatpush.bf16.msrb.mxu2 %v1931_v34 }
 0x317   :  { %1423 = vmatmul.bf16.gmra.mxu0 %v1331_v36 }
 0x31c   :  { %v1409_v55 = vpop.f32.mrf.mxu0 }
 0x31d   :  { %v1410_v39 = vadd.f32 %v2766_v31, %v1409_v55 }
 0x31f   :  { %v1429_v30 = vmax.f32 %v1410_v39, 0.0 }
 0x321   :  { %v1445_v6 = vrot.slane %v1429_v30, 4  ;;  %v1462_v19 = vsel %vm1461_vm11, %v1429_v30, 0.0  ;;  %v1930_v30 = vld [vmem:[%s2885_s6 + $0x28] sm:$0xff] }
 0x322   :  { %1662 = vmatpush.bf16.msrb.mxu2 %v1930_v30 }
 0x323   :  { %v1463_v54 = vsel %vm1461_vm11, %v1445_v6, 0.0 }
 0x324   :  { %v1411_v18 = vpop.f32.mrf.mxu0  ;;  %v1464_v49 = vadd.f32 %v1463_v54, %v1462_v19  ;;  %v1929_v54 = vld [vmem:[%s2885_s6 + $0x20] sm:$0xff] }
 0x325   :  { %v1412_v33 = vadd.f32 %v2766_v31, %v1411_v18 }
 0x326   :  { %1663 = vmatpush.bf16.msrb.mxu2 %v1929_v54 }
 0x327   :  { %v1430_v58 = vmax.f32 %v1412_v33, 0.0 }
 0x329   :  { %v1446_v51 = vrot.slane %v1430_v58, 4  ;;  %v1465_v47 = vsel %vm1461_vm11, %v1430_v58, 0.0 }
 0x32a   :  { %v1466_v8 = vadd.f32 %v1465_v47, %v1464_v49  ;;  %1664 = vmatpush.bf16.msrb.mxu2 %v1928_v53 }
 0x32b   :  { %v1467_v20 = vsel %vm1461_vm11, %v1446_v51, 0.0 }
 0x32c   :  { %v1468_v3 = vadd.f32 %v1467_v20, %v1466_v8 }
 0x33a   :  { %v1414_v29 = vpop.f32.mrf.mxu0 }
 0x33b   :  { %v1415_v24 = vadd.f32 %v2766_v31, %v1414_v29 }
 0x33d   :  { %v1431_v12 = vmax.f32 %v1415_v24, 0.0 }
 0x33f   :  { %v1447_v7 = vrot.slane %v1431_v12, 4  ;;  %v1469_v61 = vsel %vm1461_vm11, %v1431_v12, 0.0  ;;  %v1927_v12 = vld [vmem:[%s2885_s6 + $0x10] sm:$0xff] }
 0x340   :  { %v1470_v9 = vadd.f32 %v1469_v61, %v1468_v3  ;;  %1665 = vmatpush.bf16.msrb.mxu2 %v1927_v12  ;;  %v1926_v61 = vld [vmem:[%s2885_s6 + $0x8] sm:$0xff]  ;;  %v1925_v3 = vld [vmem:[%s2885_s6] sm:$0xff] }
 0x341   :  { %v1471_v38 = vsel %vm1461_vm11, %v1447_v7, 0.0 }
 0x342   :  { %v1416_v17 = vpop.f32.mrf.mxu0  ;;  %v1472_v40 = vadd.f32 %v1471_v38, %v1470_v9  ;;  %v1939_v9 = vld [vmem:[%s2887_s8 + $0x30] sm:$0xff]  ;;  %v1937_v38 = vld [vmem:[%s2887_s8 + $0x20] sm:$0xff] }
 0x343   :  { %v1417_v22 = vadd.f32 %v2766_v31, %v1416_v17  ;;  %1744 = vmatpush.bf16.msra.mxu3 %v1939_v9  ;;  %v1938_v17 = vld [vmem:[%s2887_s8 + $0x28] sm:$0xff] }
 0x344   :  { %1666 = vmatpush.bf16.msrb.mxu2 %v1926_v61 }
 0x345   :  { %v1432_v41 = vmax.f32 %v1417_v22, 0.0  ;;  %v1936_v22 = vld [vmem:[%s2887_s8 + $0x18] sm:$0xff] }
 0x347   :  { %v1448_v2 = vrot.slane %v1432_v41, 4  ;;  %v1473_v44 = vsel %vm1461_vm11, %v1432_v41, 0.0  ;;  %1745 = vmatpush.bf16.msra.mxu3 %v1938_v17  ;;  %v1935_v41 = vld [vmem:[%s2887_s8 + $0x10] sm:$0xff] }
 0x348   :  { %v1474_v27 = vadd.f32 %v1473_v44, %v1472_v40  ;;  %1667 = vmatpush.bf16.msrb.mxu2 %v1925_v3 }
 0x349   :  { %v1475_v45 = vsel %vm1461_vm11, %v1448_v2, 0.0 }
 0x34a   :  { %v1476_v57 = vadd.f32 %v1475_v45, %v1474_v27  ;;  %v1419_v21 = vpop.f32.mrf.mxu0 }
 0x34b   :  { %v1420_v13 = vadd.f32 %v2766_v31, %v1419_v21  ;;  %1746 = vmatpush.bf16.msra.mxu3 %v1937_v38 }
 0x34c   :  { %v1499_v48 = vmul.f32 %v1498_v4, %v1476_v57  ;;  %v1933_v57 = vld [vmem:[%s2887_s8] sm:$0xff] }
 0x34d   :  { %v1433_v0 = vmax.f32 %v1420_v13, 0.0 }
 0x34e   :  { %1503 = vst [vmem:[#allocation1] ss:$2 sm:$0xff] %v1499_v48  ;;  %v1961_v48 = vld [vmem:[%s2886_s7] ss:$0 sm:$0xff] }
 0x34f   :  { %v1449_v56 = vrot.slane %v1433_v0, 4  ;;  %v1477_v26 = vsel %vm1461_vm11, %v1433_v0, 0.0  ;;  %1747 = vmatpush.bf16.msra.mxu3 %v1936_v22 }
 0x351   :  { %v1478_v50 = vsel %vm1461_vm11, %v1449_v56, 0.0 }
 0x352   :  { %v1421_v46 = vpop.f32.mrf.mxu0  ;;  %v1479_v37 = vadd.f32 %v1478_v50, %v1477_v26 }
 0x353   :  { %v1422_v5 = vadd.f32 %v2766_v31, %v1421_v46  ;;  %1748 = vmatpush.bf16.msra.mxu3 %v1935_v41 }
 0x355   :  { %v1434_v1 = vmax.f32 %v1422_v5, 0.0 }
 0x357   :  { %v1450_v11 = vrot.slane %v1434_v1, 4  ;;  %v1480_v15 = vsel %vm1461_vm11, %v1434_v1, 0.0 }
 0x358   :  { %v1481_v55 = vadd.f32 %v1480_v15, %v1479_v37 }
 0x359   :  { %v1482_v39 = vsel %vm1461_vm11, %v1450_v11, 0.0 }
 0x35a   :  { %v1483_v6 = vadd.f32 %v1482_v39, %v1481_v55 }
 0x394   :  { %v1424_v43 = vpop.f32.mrf.mxu0 }
 0x395   :  { %v1425_v36 = vadd.f32 %v2766_v31, %v1424_v43 }
 0x397   :  { %v1435_v18 = vmax.f32 %v1425_v36, 0.0 }
 0x399   :  { %v1451_v42 = vrot.slane %v1435_v18, 4  ;;  %v1484_v33 = vsel %vm1461_vm11, %v1435_v18, 0.0 }
 0x39a   :  { %v1485_v58 = vadd.f32 %v1484_v33, %v1483_v6 }
 0x39b   :  { %v1486_v19 = vsel %vm1461_vm11, %v1451_v42, 0.0 }
 0x39c   :  { %v1426_v32 = vpop.f32.mrf.mxu0  ;;  %v1487_v25 = vadd.f32 %v1486_v19, %v1485_v58 }
 0x39d   :  { %v1427_v51 = vadd.f32 %v2766_v31, %v1426_v32 }
 0x39f   :  { %v1436_v47 = vmax.f32 %v1427_v51, 0.0 }
 0x3a1   :  { %v1452_v49 = vrot.slane %v1436_v47, 4  ;;  %v1488_v29 = vsel %vm1461_vm11, %v1436_v47, 0.0 }
 0x3a2   :  { %v1489_v24 = vadd.f32 %v1488_v29, %v1487_v25 }
 0x3a3   :  { %v1490_v8 = vsel %vm1461_vm11, %v1452_v49, 0.0 }
 0x3a4   :  { %v1491_v20 = vadd.f32 %v1490_v8, %v1489_v24 }
 0x3a6   :  { %v1500_v31 = vmul.f32 %v1498_v4, %v1491_v20  ;;  %v1934_v4 = vld [vmem:[%s2887_s8 + $0x8] sm:$0xff] }
 0x3a7   :  { %1749 = vmatpush.bf16.msra.mxu3 %v1934_v4 }
 0x3a8   :  { %1505 = vst [vmem:[#allocation1 + $0x1] ss:$2 sm:$0xff] %v1500_v31 }
 0x3ab   :  { %1750 = vmatpush.bf16.msra.mxu3 %v1933_v57 }
 0x3af   :  { %v1506_v35 = vld.sshfl [vmem:[#allocation1] sm:$0xff pattern:$0x75316420] }
 0x3b0   :  { %v1508_v7 = vpack.c.bf16 %v1506_v35, %v1506_v35 }
 0x3b2   :  { %1585 = vmatmul.bf16.vlgmr.msrb.gmra.mxu1 %v1508_v7 }
 0x42f   :  { %v1586_v40 = vpop.f32.mrf.mxu1 }
 0x430   :  { %v1587_v2 = vadd.f32 %v1960_v28, %v1586_v40 }
 0x432   :  { %v1590_v44 = vmax.f32 %v1587_v2, 0.0 }
 0x434   :  { %v1591_v27 = vpack.c.bf16 %v1590_v44, %v1590_v44 }
 0x436   :  { %1668 = vmatmul.bf16.vlgmr.msrb.gmra.mxu2 %v1591_v27 }
 0x437   :  { %v1588_v45 = vpop.f32.mrf.mxu1 }
 0x4b9   :  { %v1669_v14 = vpop.f32.mrf.mxu2 }
 0x4ba   :  { %v1670_v63 = vadd.f32 %v1961_v48, %v1669_v14 }
 0x4bc   :  { %v1673_v21 = vmax.f32 %v1670_v63, 0.0 }
 0x4be   :  { %v1674_v62 = vpack.c.bf16 %v1673_v21, %v1673_v21 }
 0x4c0   :  { %1751 = vmatmul.bf16.vlgmr.msra.gmra.mxu3 %v1674_v62 }
 0x4c1   :  { %v1671_v13 = vpop.f32.mrf.mxu2 }
 0x543   :  { %v1752_v46 = vpop.f32.mrf.mxu3 }
 0x544   :  { %v1753_v10 = vadd.f32 %v1962_v60, %v1752_v46 }
 0x546   :  { %v1757_v0 = vrot.slane %v1753_v10, 4  ;;  %1759 = vst [vmem:[%s2889_s10] sm:$0xf] %v1753_v10 }
 0x548   :  { %1760 = vst [vmem:[%s2889_s10 + $0x4] sm:$0xf] %v1757_v0 }
 0x54b   :  { %v1754_v5 = vpop.f32.mrf.mxu3 }

</bundles_post_ra>
